<compile_context>
chip_gen: v7x
topology: tpu7x:2x2x1
jax: 0.10.0
libtpu: 0.0.40
codegen_flags: <defaults>
</compile_context>

<pallas_src>
import jax
import jax.numpy as jnp
import numpy as np
from jax.experimental import pallas as pl
from jax.experimental.pallas import tpu as pltpu


def _mbd_kernel(m_i_ref, m_jT_ref, o_ref):
    # m_i_ref : (TI, B*C)  query-row features (resident across the j grid axis)
    # m_jT_ref: (B*C, TJ)  streamed minibatch rows, pre-transposed (j on lanes)
    # o_ref   : (TI, B)    output block, resident & accumulated across j
    j_step = pl.program_id(1)

    @pl.when(j_step == 0)
    def _():
        o_ref[...] = jnp.zeros_like(o_ref)

    m_i = m_i_ref[...]           # (TI, BC) f32
    m_jT = m_jT_ref[...]         # (BC, TJ) f32

    bc_total = m_i.shape[1]
    n_out = o_ref.shape[1]       # B  (out_features)
    c = bc_total // n_out        # C  (kernel_dims)

    cols = []
    for b in range(n_out):
        # Lane-dense (TI, TJ) L1 distance for output feature b:
        #   dist[i, j] = sum_c |M_i[i, b*C+c] - M_j[j, b*C+c]|
        # (TI,1) column broadcasts across lanes, (1,TJ) row across sublanes.
        base = b * c
        dist = jnp.abs(m_i[:, base:base + 1] - m_jT[base:base + 1, :])
        for k in range(1, c):
            idx = base + k
            dist = dist + jnp.abs(m_i[:, idx:idx + 1] - m_jT[idx:idx + 1, :])
        # Lane-dense exp (EUP) + j-reduction (XLU) -> (TI, 1)
        cols.append(jnp.sum(jnp.exp(-dist), axis=1, keepdims=True))

    # Single (TI, B) add into the grid-resident output block.
    o_ref[...] += jnp.concatenate(cols, axis=1).astype(o_ref.dtype)


def _pick_i_tile(n, cap):
    """Sublane-axis tile: multiple-of-8 divisor of n (<= cap), else the full axis.
    Also caps at max(8, n // 2) so grid[0] >= 2 whenever possible (v7x megacore)."""
    eff_cap = min(cap, max(8, n // 2))
    t = (min(eff_cap, n) // 8) * 8
    while t >= 8:
        if n % t == 0:
            return t
        t -= 8
    return n


def _pick_j_tile(n, cap):
    """Lane-axis tile: multiple-of-128 divisor of n (<= cap), else the full axis."""
    t = (min(cap, n) // 128) * 128
    while t >= 128:
        if n % t == 0:
            return t
        t -= 128
    return n


def minibatch_discrimination(x, T, *, i_tile_cap=256, j_tile_cap=256,
                             matmul_dtype=None):
    """x: (N, in_features) f32, T: (in_features, out_features, kernel_dims) f32."""
    N, F = x.shape
    Fi, B, C = T.shape
    assert Fi == F
    BC = B * C

    # Same packing as torch's T.view(F, -1): column index = b*C + c.
    t2d = T.reshape(F, BC)
    x_mm = x
    if matmul_dtype is not None:            # optional bf16 MXU inputs (v6e/v7x)
        x_mm = x.astype(matmul_dtype)
        t2d = t2d.astype(matmul_dtype)

    # Precompute M once with plain XLA (f32 accumulation); the kernel never sees F.
    M = jnp.dot(x_mm, t2d, preferred_element_type=jnp.float32)    # (N, B*C)
    MT = M.T                                                      # (B*C, N) j-on-lanes

    ti = _pick_i_tile(N, i_tile_cap)
    tj = _pick_j_tile(N, j_tile_cap)
    grid = (N // ti, N // tj)

    return pl.pallas_call(
        _mbd_kernel,
        out_shape=jax.ShapeDtypeStruct((N, B), jnp.float32),
        grid_spec=pltpu.PrefetchScalarGridSpec(
            num_scalar_prefetch=0,
            grid=grid,
            in_specs=[
                pl.BlockSpec((ti, BC), lambda i, j: (i, 0)),   # query rows (resident)
                pl.BlockSpec((BC, tj), lambda i, j: (0, j)),   # streamed j columns
            ],
            out_specs=pl.BlockSpec((ti, B), lambda i, j: (i, 0)),
        ),
        compiler_params=pltpu.CompilerParams(
            # i-tiles independent -> megacore-parallel; j is the reduction axis.
            dimension_semantics=("parallel", "arbitrary"),
        ),
    )(M, MT)


def _reference(x, T):
    # Pure-JAX reference mirroring the PyTorch module.
    N = x.shape[0]
    F, B, C = T.shape
    M = jnp.dot(x, T.reshape(F, B * C),
                preferred_element_type=jnp.float32).reshape(N, B, C)
    diff = jnp.sum(jnp.abs(M[:, None, :, :] - M[None, :, :, :]), axis=-1)  # (N, N, B)
    return jnp.sum(jnp.exp(-diff), axis=1)                                  # (N, B)


if __name__ == "__main__":
    key = jax.random.PRNGKey(0)
    kx, kt, kx2, kx3 = jax.random.split(key, 4)

    # Test 1: module-consistent small shapes, single grid step.
    N, in_features, out_features, kernel_dims = 8, 32, 16, 5
    x = jax.random.normal(kx, (N, in_features), dtype=jnp.float32)
    T = jax.random.normal(kt, (in_features, out_features, kernel_dims),
                          dtype=jnp.float32)

    out = jax.block_until_ready(minibatch_discrimination(x, T))
    ref = _reference(x, T)
    assert out.shape == (N, out_features)
    assert np.allclose(np.asarray(out), np.asarray(ref), rtol=1e-4, atol=1e-5)

    # Test 2: i-tiled "parallel" axis (grid[0] == 2, tj = full axis).
    N2 = 16
    x2 = jax.random.normal(kx2, (N2, in_features), dtype=jnp.float32)
    out2 = jax.block_until_ready(minibatch_discrimination(x2, T))
    ref2 = _reference(x2, T)
    assert out2.shape == (N2, out_features)
    assert np.allclose(np.asarray(out2), np.asarray(ref2), rtol=1e-4, atol=1e-5)

    # Test 3: streamed j-reduction across grid steps (grid = (2, 2)).
    N3 = 256
    x3 = jax.random.normal(kx3, (N3, in_features), dtype=jnp.float32)
    out3 = jax.block_until_ready(
        minibatch_discrimination(x3, T, i_tile_cap=128, j_tile_cap=128))
    ref3 = _reference(x3, T)
    assert out3.shape == (N3, out_features)
    assert np.allclose(np.asarray(out3), np.asarray(ref3), rtol=1e-4, atol=1e-4)

    print("KERNEL_OK")
</pallas_src>

<mosaic_0001>
module attributes {stable_mosaic.version = 11 : i64} {
  func.func @_mbd_kernel(%arg0: i32, %arg1: i32, %arg2: memref<8x80xf32, #tpu.memory_space<vmem>>, %arg3: memref<80x8xf32, #tpu.memory_space<vmem>>, %arg4: memref<8x16xf32, #tpu.memory_space<vmem>>) attributes {dimension_semantics = [#tpu.dimension_semantics<parallel>, #tpu.dimension_semantics<arbitrary>], iteration_bounds = array<i64: 1, 1>, scalar_prefetch = 0 : i64, scratch_operands = 0 : i64, tpu.core_type = #tpu.core_type<tc>, window_params = [{transform_indices = @transform_0, window_bounds = array<i64: 8, 80>}, {transform_indices = @transform_1, window_bounds = array<i64: 80, 8>}, {transform_indices = @transform_2, window_bounds = array<i64: 8, 16>}]} {
    %c0_i32 = arith.constant 0 : i32
    %0 = arith.cmpi eq, %arg1, %c0_i32 : i32
    %1 = arith.extui %0 : i1 to i32
    %c0_i32_0 = arith.constant 0 : i32
    %2 = arith.cmpi ne, %1, %c0_i32_0 : i32
    scf.if %2 {
      %cst_39 = arith.constant 0.000000e+00 : f32
      %633 = vector.broadcast %cst_39 : f32 to vector<8x16xf32>
      %c0_40 = arith.constant 0 : index
      %c0_41 = arith.constant 0 : index
      %634 = vector.load %arg4[%c0_40, %c0_41] : memref<8x16xf32, #tpu.memory_space<vmem>>, vector<8x16xf32>
      tpu.vector_store %arg4[%c0_40, %c0_41], %633 {strides = array<i32>} : memref<8x16xf32, #tpu.memory_space<vmem>>, vector<8x16xf32>,
    } else {
    }
    %c0 = arith.constant 0 : index
    %c0_1 = arith.constant 0 : index
    %3 = vector.load %arg2[%c0, %c0_1] : memref<8x80xf32, #tpu.memory_space<vmem>>, vector<8x80xf32>
    %c0_2 = arith.constant 0 : index
    %c0_3 = arith.constant 0 : index
    %4 = vector.load %arg3[%c0_2, %c0_3] : memref<80x8xf32, #tpu.memory_space<vmem>>, vector<80x8xf32>
    %5 = vector.extract_strided_slice %3 {offsets = [0, 0], sizes = [8, 1], strides = [1, 1]} : vector<8x80xf32> to vector<8x1xf32>
    %6 = vector.extract_strided_slice %4 {offsets = [0, 0], sizes = [1, 8], strides = [1, 1]} : vector<80x8xf32> to vector<1x8xf32>
    %7 = vector.broadcast %5 : vector<8x1xf32> to vector<8x8xf32>
    %8 = vector.broadcast %6 : vector<1x8xf32> to vector<8x8xf32>
    %9 = arith.subf %7, %8 : vector<8x8xf32>
    %10 = math.absf %9 : vector<8x8xf32>
    %11 = vector.extract_strided_slice %3 {offsets = [0, 1], sizes = [8, 1], strides = [1, 1]} : vector<8x80xf32> to vector<8x1xf32>
    %12 = vector.extract_strided_slice %4 {offsets = [1, 0], sizes = [1, 8], strides = [1, 1]} : vector<80x8xf32> to vector<1x8xf32>
    %13 = vector.broadcast %11 : vector<8x1xf32> to vector<8x8xf32>
    %14 = vector.broadcast %12 : vector<1x8xf32> to vector<8x8xf32>
    %15 = arith.subf %13, %14 : vector<8x8xf32>
    %16 = math.absf %15 : vector<8x8xf32>
    %17 = arith.addf %10, %16 : vector<8x8xf32>
    %18 = vector.extract_strided_slice %3 {offsets = [0, 2], sizes = [8, 1], strides = [1, 1]} : vector<8x80xf32> to vector<8x1xf32>
    %19 = vector.extract_strided_slice %4 {offsets = [2, 0], sizes = [1, 8], strides = [1, 1]} : vector<80x8xf32> to vector<1x8xf32>
    %20 = vector.broadcast %18 : vector<8x1xf32> to vector<8x8xf32>
    %21 = vector.broadcast %19 : vector<1x8xf32> to vector<8x8xf32>
    %22 = arith.subf %20, %21 : vector<8x8xf32>
    %23 = math.absf %22 : vector<8x8xf32>
    %24 = arith.addf %17, %23 : vector<8x8xf32>
    %25 = vector.extract_strided_slice %3 {offsets = [0, 3], sizes = [8, 1], strides = [1, 1]} : vector<8x80xf32> to vector<8x1xf32>
    %26 = vector.extract_strided_slice %4 {offsets = [3, 0], sizes = [1, 8], strides = [1, 1]} : vector<80x8xf32> to vector<1x8xf32>
    %27 = vector.broadcast %25 : vector<8x1xf32> to vector<8x8xf32>
    %28 = vector.broadcast %26 : vector<1x8xf32> to vector<8x8xf32>
    %29 = arith.subf %27, %28 : vector<8x8xf32>
    %30 = math.absf %29 : vector<8x8xf32>
    %31 = arith.addf %24, %30 : vector<8x8xf32>
    %32 = vector.extract_strided_slice %3 {offsets = [0, 4], sizes = [8, 1], strides = [1, 1]} : vector<8x80xf32> to vector<8x1xf32>
    %33 = vector.extract_strided_slice %4 {offsets = [4, 0], sizes = [1, 8], strides = [1, 1]} : vector<80x8xf32> to vector<1x8xf32>
    %34 = vector.broadcast %32 : vector<8x1xf32> to vector<8x8xf32>
    %35 = vector.broadcast %33 : vector<1x8xf32> to vector<8x8xf32>
    %36 = arith.subf %34, %35 : vector<8x8xf32>
    %37 = math.absf %36 : vector<8x8xf32>
    %38 = arith.addf %31, %37 : vector<8x8xf32>
    %cst = arith.constant 0.000000e+00 : f32
    %39 = vector.broadcast %cst : f32 to vector<8x8xf32>
    %40 = arith.subf %39, %38 : vector<8x8xf32>
    %41 = math.exp %40 : vector<8x8xf32>
    %cst_4 = arith.constant dense<0.000000e+00> : vector<8xf32>
    %42 = vector.multi_reduction <add>, %41, %cst_4 [1] : vector<8x8xf32> to vector<8xf32>
    %43 = vector.shape_cast %42 : vector<8xf32> to vector<8x1xf32>
    %44 = vector.extract_strided_slice %3 {offsets = [0, 5], sizes = [8, 1], strides = [1, 1]} : vector<8x80xf32> to vector<8x1xf32>
    %45 = vector.extract_strided_slice %4 {offsets = [5, 0], sizes = [1, 8], strides = [1, 1]} : vector<80x8xf32> to vector<1x8xf32>
    %46 = vector.broadcast %44 : vector<8x1xf32> to vector<8x8xf32>
    %47 = vector.broadcast %45 : vector<1x8xf32> to vector<8x8xf32>
    %48 = arith.subf %46, %47 : vector<8x8xf32>
    %49 = math.absf %48 : vector<8x8xf32>
    %50 = vector.extract_strided_slice %3 {offsets = [0, 6], sizes = [8, 1], strides = [1, 1]} : vector<8x80xf32> to vector<8x1xf32>
    %51 = vector.extract_strided_slice %4 {offsets = [6, 0], sizes = [1, 8], strides = [1, 1]} : vector<80x8xf32> to vector<1x8xf32>
    %52 = vector.broadcast %50 : vector<8x1xf32> to vector<8x8xf32>
    %53 = vector.broadcast %51 : vector<1x8xf32> to vector<8x8xf32>
    %54 = arith.subf %52, %53 : vector<8x8xf32>
    %55 = math.absf %54 : vector<8x8xf32>
    %56 = arith.addf %49, %55 : vector<8x8xf32>
    %57 = vector.extract_strided_slice %3 {offsets = [0, 7], sizes = [8, 1], strides = [1, 1]} : vector<8x80xf32> to vector<8x1xf32>
    %58 = vector.extract_strided_slice %4 {offsets = [7, 0], sizes = [1, 8], strides = [1, 1]} : vector<80x8xf32> to vector<1x8xf32>
    %59 = vector.broadcast %57 : vector<8x1xf32> to vector<8x8xf32>
    %60 = vector.broadcast %58 : vector<1x8xf32> to vector<8x8xf32>
    %61 = arith.subf %59, %60 : vector<8x8xf32>
    %62 = math.absf %61 : vector<8x8xf32>
    %63 = arith.addf %56, %62 : vector<8x8xf32>
    %64 = vector.extract_strided_slice %3 {offsets = [0, 8], sizes = [8, 1], strides = [1, 1]} : vector<8x80xf32> to vector<8x1xf32>
    %65 = vector.extract_strided_slice %4 {offsets = [8, 0], sizes = [1, 8], strides = [1, 1]} : vector<80x8xf32> to vector<1x8xf32>
    %66 = vector.broadcast %64 : vector<8x1xf32> to vector<8x8xf32>
    %67 = vector.broadcast %65 : vector<1x8xf32> to vector<8x8xf32>
    %68 = arith.subf %66, %67 : vector<8x8xf32>
    %69 = math.absf %68 : vector<8x8xf32>
    %70 = arith.addf %63, %69 : vector<8x8xf32>
    %71 = vector.extract_strided_slice %3 {offsets = [0, 9], sizes = [8, 1], strides = [1, 1]} : vector<8x80xf32> to vector<8x1xf32>
    %72 = vector.extract_strided_slice %4 {offsets = [9, 0], sizes = [1, 8], strides = [1, 1]} : vector<80x8xf32> to vector<1x8xf32>
    %73 = vector.broadcast %71 : vector<8x1xf32> to vector<8x8xf32>
    %74 = vector.broadcast %72 : vector<1x8xf32> to vector<8x8xf32>
    %75 = arith.subf %73, %74 : vector<8x8xf32>
    %76 = math.absf %75 : vector<8x8xf32>
    %77 = arith.addf %70, %76 : vector<8x8xf32>
    %cst_5 = arith.constant 0.000000e+00 : f32
    %78 = vector.broadcast %cst_5 : f32 to vector<8x8xf32>
    %79 = arith.subf %78, %77 : vector<8x8xf32>
    %80 = math.exp %79 : vector<8x8xf32>
    %cst_6 = arith.constant dense<0.000000e+00> : vector<8xf32>
    %81 = vector.multi_reduction <add>, %80, %cst_6 [1] : vector<8x8xf32> to vector<8xf32>
    %82 = vector.shape_cast %81 : vector<8xf32> to vector<8x1xf32>
    %83 = vector.extract_strided_slice %3 {offsets = [0, 10], sizes = [8, 1], strides = [1, 1]} : vector<8x80xf32> to vector<8x1xf32>
    %84 = vector.extract_strided_slice %4 {offsets = [10, 0], sizes = [1, 8], strides = [1, 1]} : vector<80x8xf32> to vector<1x8xf32>
    %85 = vector.broadcast %83 : vector<8x1xf32> to vector<8x8xf32>
    %86 = vector.broadcast %84 : vector<1x8xf32> to vector<8x8xf32>
    %87 = arith.subf %85, %86 : vector<8x8xf32>
    %88 = math.absf %87 : vector<8x8xf32>
    %89 = vector.extract_strided_slice %3 {offsets = [0, 11], sizes = [8, 1], strides = [1, 1]} : vector<8x80xf32> to vector<8x1xf32>
    %90 = vector.extract_strided_slice %4 {offsets = [11, 0], sizes = [1, 8], strides = [1, 1]} : vector<80x8xf32> to vector<1x8xf32>
    %91 = vector.broadcast %89 : vector<8x1xf32> to vector<8x8xf32>
    %92 = vector.broadcast %90 : vector<1x8xf32> to vector<8x8xf32>
    %93 = arith.subf %91, %92 : vector<8x8xf32>
    %94 = math.absf %93 : vector<8x8xf32>
    %95 = arith.addf %88, %94 : vector<8x8xf32>
    %96 = vector.extract_strided_slice %3 {offsets = [0, 12], sizes = [8, 1], strides = [1, 1]} : vector<8x80xf32> to vector<8x1xf32>
    %97 = vector.extract_strided_slice %4 {offsets = [12, 0], sizes = [1, 8], strides = [1, 1]} : vector<80x8xf32> to vector<1x8xf32>
    %98 = vector.broadcast %96 : vector<8x1xf32> to vector<8x8xf32>
    %99 = vector.broadcast %97 : vector<1x8xf32> to vector<8x8xf32>
    %100 = arith.subf %98, %99 : vector<8x8xf32>
    %101 = math.absf %100 : vector<8x8xf32>
    %102 = arith.addf %95, %101 : vector<8x8xf32>
    %103 = vector.extract_strided_slice %3 {offsets = [0, 13], sizes = [8, 1], strides = [1, 1]} : vector<8x80xf32> to vector<8x1xf32>
    %104 = vector.extract_strided_slice %4 {offsets = [13, 0], sizes = [1, 8], strides = [1, 1]} : vector<80x8xf32> to vector<1x8xf32>
    %105 = vector.broadcast %103 : vector<8x1xf32> to vector<8x8xf32>
    %106 = vector.broadcast %104 : vector<1x8xf32> to vector<8x8xf32>
    %107 = arith.subf %105, %106 : vector<8x8xf32>
    %108 = math.absf %107 : vector<8x8xf32>
    %109 = arith.addf %102, %108 : vector<8x8xf32>
    %110 = vector.extract_strided_slice %3 {offsets = [0, 14], sizes = [8, 1], strides = [1, 1]} : vector<8x80xf32> to vector<8x1xf32>
    %111 = vector.extract_strided_slice %4 {offsets = [14, 0], sizes = [1, 8], strides = [1, 1]} : vector<80x8xf32> to vector<1x8xf32>
    %112 = vector.broadcast %110 : vector<8x1xf32> to vector<8x8xf32>
    %113 = vector.broadcast %111 : vector<1x8xf32> to vector<8x8xf32>
    %114 = arith.subf %112, %113 : vector<8x8xf32>
    %115 = math.absf %114 : vector<8x8xf32>
    %116 = arith.addf %109, %115 : vector<8x8xf32>
    %cst_7 = arith.constant 0.000000e+00 : f32
    %117 = vector.broadcast %cst_7 : f32 to vector<8x8xf32>
    %118 = arith.subf %117, %116 : vector<8x8xf32>
    %119 = math.exp %118 : vector<8x8xf32>
    %cst_8 = arith.constant dense<0.000000e+00> : vector<8xf32>
    %120 = vector.multi_reduction <add>, %119, %cst_8 [1] : vector<8x8xf32> to vector<8xf32>
    %121 = vector.shape_cast %120 : vector<8xf32> to vector<8x1xf32>
    %122 = vector.extract_strided_slice %3 {offsets = [0, 15], sizes = [8, 1], strides = [1, 1]} : vector<8x80xf32> to vector<8x1xf32>
    %123 = vector.extract_strided_slice %4 {offsets = [15, 0], sizes = [1, 8], strides = [1, 1]} : vector<80x8xf32> to vector<1x8xf32>
    %124 = vector.broadcast %122 : vector<8x1xf32> to vector<8x8xf32>
    %125 = vector.broadcast %123 : vector<1x8xf32> to vector<8x8xf32>
    %126 = arith.subf %124, %125 : vector<8x8xf32>
    %127 = math.absf %126 : vector<8x8xf32>
    %128 = vector.extract_strided_slice %3 {offsets = [0, 16], sizes = [8, 1], strides = [1, 1]} : vector<8x80xf32> to vector<8x1xf32>
    %129 = vector.extract_strided_slice %4 {offsets = [16, 0], sizes = [1, 8], strides = [1, 1]} : vector<80x8xf32> to vector<1x8xf32>
    %130 = vector.broadcast %128 : vector<8x1xf32> to vector<8x8xf32>
    %131 = vector.broadcast %129 : vector<1x8xf32> to vector<8x8xf32>
    %132 = arith.subf %130, %131 : vector<8x8xf32>
    %133 = math.absf %132 : vector<8x8xf32>
    %134 = arith.addf %127, %133 : vector<8x8xf32>
    %135 = vector.extract_strided_slice %3 {offsets = [0, 17], sizes = [8, 1], strides = [1, 1]} : vector<8x80xf32> to vector<8x1xf32>
    %136 = vector.extract_strided_slice %4 {offsets = [17, 0], sizes = [1, 8], strides = [1, 1]} : vector<80x8xf32> to vector<1x8xf32>
    %137 = vector.broadcast %135 : vector<8x1xf32> to vector<8x8xf32>
    %138 = vector.broadcast %136 : vector<1x8xf32> to vector<8x8xf32>
    %139 = arith.subf %137, %138 : vector<8x8xf32>
    %140 = math.absf %139 : vector<8x8xf32>
    %141 = arith.addf %134, %140 : vector<8x8xf32>
    %142 = vector.extract_strided_slice %3 {offsets = [0, 18], sizes = [8, 1], strides = [1, 1]} : vector<8x80xf32> to vector<8x1xf32>
    %143 = vector.extract_strided_slice %4 {offsets = [18, 0], sizes = [1, 8], strides = [1, 1]} : vector<80x8xf32> to vector<1x8xf32>
    %144 = vector.broadcast %142 : vector<8x1xf32> to vector<8x8xf32>
    %145 = vector.broadcast %143 : vector<1x8xf32> to vector<8x8xf32>
    %146 = arith.subf %144, %145 : vector<8x8xf32>
    %147 = math.absf %146 : vector<8x8xf32>
    %148 = arith.addf %141, %147 : vector<8x8xf32>
    %149 = vector.extract_strided_slice %3 {offsets = [0, 19], sizes = [8, 1], strides = [1, 1]} : vector<8x80xf32> to vector<8x1xf32>
    %150 = vector.extract_strided_slice %4 {offsets = [19, 0], sizes = [1, 8], strides = [1, 1]} : vector<80x8xf32> to vector<1x8xf32>
    %151 = vector.broadcast %149 : vector<8x1xf32> to vector<8x8xf32>
    %152 = vector.broadcast %150 : vector<1x8xf32> to vector<8x8xf32>
    %153 = arith.subf %151, %152 : vector<8x8xf32>
    %154 = math.absf %153 : vector<8x8xf32>
    %155 = arith.addf %148, %154 : vector<8x8xf32>
    %cst_9 = arith.constant 0.000000e+00 : f32
    %156 = vector.broadcast %cst_9 : f32 to vector<8x8xf32>
    %157 = arith.subf %156, %155 : vector<8x8xf32>
    %158 = math.exp %157 : vector<8x8xf32>
    %cst_10 = arith.constant dense<0.000000e+00> : vector<8xf32>
    %159 = vector.multi_reduction <add>, %158, %cst_10 [1] : vector<8x8xf32> to vector<8xf32>
    %160 = vector.shape_cast %159 : vector<8xf32> to vector<8x1xf32>
    %161 = vector.extract_strided_slice %3 {offsets = [0, 20], sizes = [8, 1], strides = [1, 1]} : vector<8x80xf32> to vector<8x1xf32>
    %162 = vector.extract_strided_slice %4 {offsets = [20, 0], sizes = [1, 8], strides = [1, 1]} : vector<80x8xf32> to vector<1x8xf32>
    %163 = vector.broadcast %161 : vector<8x1xf32> to vector<8x8xf32>
    %164 = vector.broadcast %162 : vector<1x8xf32> to vector<8x8xf32>
    %165 = arith.subf %163, %164 : vector<8x8xf32>
    %166 = math.absf %165 : vector<8x8xf32>
    %167 = vector.extract_strided_slice %3 {offsets = [0, 21], sizes = [8, 1], strides = [1, 1]} : vector<8x80xf32> to vector<8x1xf32>
    %168 = vector.extract_strided_slice %4 {offsets = [21, 0], sizes = [1, 8], strides = [1, 1]} : vector<80x8xf32> to vector<1x8xf32>
    %169 = vector.broadcast %167 : vector<8x1xf32> to vector<8x8xf32>
    %170 = vector.broadcast %168 : vector<1x8xf32> to vector<8x8xf32>
    %171 = arith.subf %169, %170 : vector<8x8xf32>
    %172 = math.absf %171 : vector<8x8xf32>
    %173 = arith.addf %166, %172 : vector<8x8xf32>
    %174 = vector.extract_strided_slice %3 {offsets = [0, 22], sizes = [8, 1], strides = [1, 1]} : vector<8x80xf32> to vector<8x1xf32>
    %175 = vector.extract_strided_slice %4 {offsets = [22, 0], sizes = [1, 8], strides = [1, 1]} : vector<80x8xf32> to vector<1x8xf32>
    %176 = vector.broadcast %174 : vector<8x1xf32> to vector<8x8xf32>
    %177 = vector.broadcast %175 : vector<1x8xf32> to vector<8x8xf32>
    %178 = arith.subf %176, %177 : vector<8x8xf32>
    %179 = math.absf %178 : vector<8x8xf32>
    %180 = arith.addf %173, %179 : vector<8x8xf32>
    %181 = vector.extract_strided_slice %3 {offsets = [0, 23], sizes = [8, 1], strides = [1, 1]} : vector<8x80xf32> to vector<8x1xf32>
    %182 = vector.extract_strided_slice %4 {offsets = [23, 0], sizes = [1, 8], strides = [1, 1]} : vector<80x8xf32> to vector<1x8xf32>
    %183 = vector.broadcast %181 : vector<8x1xf32> to vector<8x8xf32>
    %184 = vector.broadcast %182 : vector<1x8xf32> to vector<8x8xf32>
    %185 = arith.subf %183, %184 : vector<8x8xf32>
    %186 = math.absf %185 : vector<8x8xf32>
    %187 = arith.addf %180, %186 : vector<8x8xf32>
    %188 = vector.extract_strided_slice %3 {offsets = [0, 24], sizes = [8, 1], strides = [1, 1]} : vector<8x80xf32> to vector<8x1xf32>
    %189 = vector.extract_strided_slice %4 {offsets = [24, 0], sizes = [1, 8], strides = [1, 1]} : vector<80x8xf32> to vector<1x8xf32>
    %190 = vector.broadcast %188 : vector<8x1xf32> to vector<8x8xf32>
    %191 = vector.broadcast %189 : vector<1x8xf32> to vector<8x8xf32>
    %192 = arith.subf %190, %191 : vector<8x8xf32>
    %193 = math.absf %192 : vector<8x8xf32>
    %194 = arith.addf %187, %193 : vector<8x8xf32>
    %cst_11 = arith.constant 0.000000e+00 : f32
    %195 = vector.broadcast %cst_11 : f32 to vector<8x8xf32>
    %196 = arith.subf %195, %194 : vector<8x8xf32>
    %197 = math.exp %196 : vector<8x8xf32>
    %cst_12 = arith.constant dense<0.000000e+00> : vector<8xf32>
    %198 = vector.multi_reduction <add>, %197, %cst_12 [1] : vector<8x8xf32> to vector<8xf32>
    %199 = vector.shape_cast %198 : vector<8xf32> to vector<8x1xf32>
    %200 = vector.extract_strided_slice %3 {offsets = [0, 25], sizes = [8, 1], strides = [1, 1]} : vector<8x80xf32> to vector<8x1xf32>
    %201 = vector.extract_strided_slice %4 {offsets = [25, 0], sizes = [1, 8], strides = [1, 1]} : vector<80x8xf32> to vector<1x8xf32>
    %202 = vector.broadcast %200 : vector<8x1xf32> to vector<8x8xf32>
    %203 = vector.broadcast %201 : vector<1x8xf32> to vector<8x8xf32>
    %204 = arith.subf %202, %203 : vector<8x8xf32>
    %205 = math.absf %204 : vector<8x8xf32>
    %206 = vector.extract_strided_slice %3 {offsets = [0, 26], sizes = [8, 1], strides = [1, 1]} : vector<8x80xf32> to vector<8x1xf32>
    %207 = vector.extract_strided_slice %4 {offsets = [26, 0], sizes = [1, 8], strides = [1, 1]} : vector<80x8xf32> to vector<1x8xf32>
    %208 = vector.broadcast %206 : vector<8x1xf32> to vector<8x8xf32>
    %209 = vector.broadcast %207 : vector<1x8xf32> to vector<8x8xf32>
    %210 = arith.subf %208, %209 : vector<8x8xf32>
    %211 = math.absf %210 : vector<8x8xf32>
    %212 = arith.addf %205, %211 : vector<8x8xf32>
    %213 = vector.extract_strided_slice %3 {offsets = [0, 27], sizes = [8, 1], strides = [1, 1]} : vector<8x80xf32> to vector<8x1xf32>
    %214 = vector.extract_strided_slice %4 {offsets = [27, 0], sizes = [1, 8], strides = [1, 1]} : vector<80x8xf32> to vector<1x8xf32>
    %215 = vector.broadcast %213 : vector<8x1xf32> to vector<8x8xf32>
    %216 = vector.broadcast %214 : vector<1x8xf32> to vector<8x8xf32>
    %217 = arith.subf %215, %216 : vector<8x8xf32>
    %218 = math.absf %217 : vector<8x8xf32>
    %219 = arith.addf %212, %218 : vector<8x8xf32>
    %220 = vector.extract_strided_slice %3 {offsets = [0, 28], sizes = [8, 1], strides = [1, 1]} : vector<8x80xf32> to vector<8x1xf32>
    %221 = vector.extract_strided_slice %4 {offsets = [28, 0], sizes = [1, 8], strides = [1, 1]} : vector<80x8xf32> to vector<1x8xf32>
    %222 = vector.broadcast %220 : vector<8x1xf32> to vector<8x8xf32>
    %223 = vector.broadcast %221 : vector<1x8xf32> to vector<8x8xf32>
    %224 = arith.subf %222, %223 : vector<8x8xf32>
    %225 = math.absf %224 : vector<8x8xf32>
    %226 = arith.addf %219, %225 : vector<8x8xf32>
    %227 = vector.extract_strided_slice %3 {offsets = [0, 29], sizes = [8, 1], strides = [1, 1]} : vector<8x80xf32> to vector<8x1xf32>
    %228 = vector.extract_strided_slice %4 {offsets = [29, 0], sizes = [1, 8], strides = [1, 1]} : vector<80x8xf32> to vector<1x8xf32>
    %229 = vector.broadcast %227 : vector<8x1xf32> to vector<8x8xf32>
    %230 = vector.broadcast %228 : vector<1x8xf32> to vector<8x8xf32>
    %231 = arith.subf %229, %230 : vector<8x8xf32>
    %232 = math.absf %231 : vector<8x8xf32>
    %233 = arith.addf %226, %232 : vector<8x8xf32>
    %cst_13 = arith.constant 0.000000e+00 : f32
    %234 = vector.broadcast %cst_13 : f32 to vector<8x8xf32>
    %235 = arith.subf %234, %233 : vector<8x8xf32>
    %236 = math.exp %235 : vector<8x8xf32>
    %cst_14 = arith.constant dense<0.000000e+00> : vector<8xf32>
    %237 = vector.multi_reduction <add>, %236, %cst_14 [1] : vector<8x8xf32> to vector<8xf32>
    %238 = vector.shape_cast %237 : vector<8xf32> to vector<8x1xf32>
    %239 = vector.extract_strided_slice %3 {offsets = [0, 30], sizes = [8, 1], strides = [1, 1]} : vector<8x80xf32> to vector<8x1xf32>
    %240 = vector.extract_strided_slice %4 {offsets = [30, 0], sizes = [1, 8], strides = [1, 1]} : vector<80x8xf32> to vector<1x8xf32>
    %241 = vector.broadcast %239 : vector<8x1xf32> to vector<8x8xf32>
    %242 = vector.broadcast %240 : vector<1x8xf32> to vector<8x8xf32>
    %243 = arith.subf %241, %242 : vector<8x8xf32>
    %244 = math.absf %243 : vector<8x8xf32>
    %245 = vector.extract_strided_slice %3 {offsets = [0, 31], sizes = [8, 1], strides = [1, 1]} : vector<8x80xf32> to vector<8x1xf32>
    %246 = vector.extract_strided_slice %4 {offsets = [31, 0], sizes = [1, 8], strides = [1, 1]} : vector<80x8xf32> to vector<1x8xf32>
    %247 = vector.broadcast %245 : vector<8x1xf32> to vector<8x8xf32>
    %248 = vector.broadcast %246 : vector<1x8xf32> to vector<8x8xf32>
    %249 = arith.subf %247, %248 : vector<8x8xf32>
    %250 = math.absf %249 : vector<8x8xf32>
    %251 = arith.addf %244, %250 : vector<8x8xf32>
    %252 = vector.extract_strided_slice %3 {offsets = [0, 32], sizes = [8, 1], strides = [1, 1]} : vector<8x80xf32> to vector<8x1xf32>
    %253 = vector.extract_strided_slice %4 {offsets = [32, 0], sizes = [1, 8], strides = [1, 1]} : vector<80x8xf32> to vector<1x8xf32>
    %254 = vector.broadcast %252 : vector<8x1xf32> to vector<8x8xf32>
    %255 = vector.broadcast %253 : vector<1x8xf32> to vector<8x8xf32>
    %256 = arith.subf %254, %255 : vector<8x8xf32>
    %257 = math.absf %256 : vector<8x8xf32>
    %258 = arith.addf %251, %257 : vector<8x8xf32>
    %259 = vector.extract_strided_slice %3 {offsets = [0, 33], sizes = [8, 1], strides = [1, 1]} : vector<8x80xf32> to vector<8x1xf32>
    %260 = vector.extract_strided_slice %4 {offsets = [33, 0], sizes = [1, 8], strides = [1, 1]} : vector<80x8xf32> to vector<1x8xf32>
    %261 = vector.broadcast %259 : vector<8x1xf32> to vector<8x8xf32>
    %262 = vector.broadcast %260 : vector<1x8xf32> to vector<8x8xf32>
    %263 = arith.subf %261, %262 : vector<8x8xf32>
    %264 = math.absf %263 : vector<8x8xf32>
    %265 = arith.addf %258, %264 : vector<8x8xf32>
    %266 = vector.extract_strided_slice %3 {offsets = [0, 34], sizes = [8, 1], strides = [1, 1]} : vector<8x80xf32> to vector<8x1xf32>
    %267 = vector.extract_strided_slice %4 {offsets = [34, 0], sizes = [1, 8], strides = [1, 1]} : vector<80x8xf32> to vector<1x8xf32>
    %268 = vector.broadcast %266 : vector<8x1xf32> to vector<8x8xf32>
    %269 = vector.broadcast %267 : vector<1x8xf32> to vector<8x8xf32>
    %270 = arith.subf %268, %269 : vector<8x8xf32>
    %271 = math.absf %270 : vector<8x8xf32>
    %272 = arith.addf %265, %271 : vector<8x8xf32>
    %cst_15 = arith.constant 0.000000e+00 : f32
    %273 = vector.broadcast %cst_15 : f32 to vector<8x8xf32>
    %274 = arith.subf %273, %272 : vector<8x8xf32>
    %275 = math.exp %274 : vector<8x8xf32>
    %cst_16 = arith.constant dense<0.000000e+00> : vector<8xf32>
    %276 = vector.multi_reduction <add>, %275, %cst_16 [1] : vector<8x8xf32> to vector<8xf32>
    %277 = vector.shape_cast %276 : vector<8xf32> to vector<8x1xf32>
    %278 = vector.extract_strided_slice %3 {offsets = [0, 35], sizes = [8, 1], strides = [1, 1]} : vector<8x80xf32> to vector<8x1xf32>
    %279 = vector.extract_strided_slice %4 {offsets = [35, 0], sizes = [1, 8], strides = [1, 1]} : vector<80x8xf32> to vector<1x8xf32>
    %280 = vector.broadcast %278 : vector<8x1xf32> to vector<8x8xf32>
    %281 = vector.broadcast %279 : vector<1x8xf32> to vector<8x8xf32>
    %282 = arith.subf %280, %281 : vector<8x8xf32>
    %283 = math.absf %282 : vector<8x8xf32>
    %284 = vector.extract_strided_slice %3 {offsets = [0, 36], sizes = [8, 1], strides = [1, 1]} : vector<8x80xf32> to vector<8x1xf32>
    %285 = vector.extract_strided_slice %4 {offsets = [36, 0], sizes = [1, 8], strides = [1, 1]} : vector<80x8xf32> to vector<1x8xf32>
    %286 = vector.broadcast %284 : vector<8x1xf32> to vector<8x8xf32>
    %287 = vector.broadcast %285 : vector<1x8xf32> to vector<8x8xf32>
    %288 = arith.subf %286, %287 : vector<8x8xf32>
    %289 = math.absf %288 : vector<8x8xf32>
    %290 = arith.addf %283, %289 : vector<8x8xf32>
    %291 = vector.extract_strided_slice %3 {offsets = [0, 37], sizes = [8, 1], strides = [1, 1]} : vector<8x80xf32> to vector<8x1xf32>
    %292 = vector.extract_strided_slice %4 {offsets = [37, 0], sizes = [1, 8], strides = [1, 1]} : vector<80x8xf32> to vector<1x8xf32>
    %293 = vector.broadcast %291 : vector<8x1xf32> to vector<8x8xf32>
    %294 = vector.broadcast %292 : vector<1x8xf32> to vector<8x8xf32>
    %295 = arith.subf %293, %294 : vector<8x8xf32>
    %296 = math.absf %295 : vector<8x8xf32>
    %297 = arith.addf %290, %296 : vector<8x8xf32>
    %298 = vector.extract_strided_slice %3 {offsets = [0, 38], sizes = [8, 1], strides = [1, 1]} : vector<8x80xf32> to vector<8x1xf32>
    %299 = vector.extract_strided_slice %4 {offsets = [38, 0], sizes = [1, 8], strides = [1, 1]} : vector<80x8xf32> to vector<1x8xf32>
    %300 = vector.broadcast %298 : vector<8x1xf32> to vector<8x8xf32>
    %301 = vector.broadcast %299 : vector<1x8xf32> to vector<8x8xf32>
    %302 = arith.subf %300, %301 : vector<8x8xf32>
    %303 = math.absf %302 : vector<8x8xf32>
    %304 = arith.addf %297, %303 : vector<8x8xf32>
    %305 = vector.extract_strided_slice %3 {offsets = [0, 39], sizes = [8, 1], strides = [1, 1]} : vector<8x80xf32> to vector<8x1xf32>
    %306 = vector.extract_strided_slice %4 {offsets = [39, 0], sizes = [1, 8], strides = [1, 1]} : vector<80x8xf32> to vector<1x8xf32>
    %307 = vector.broadcast %305 : vector<8x1xf32> to vector<8x8xf32>
    %308 = vector.broadcast %306 : vector<1x8xf32> to vector<8x8xf32>
    %309 = arith.subf %307, %308 : vector<8x8xf32>
    %310 = math.absf %309 : vector<8x8xf32>
    %311 = arith.addf %304, %310 : vector<8x8xf32>
    %cst_17 = arith.constant 0.000000e+00 : f32
    %312 = vector.broadcast %cst_17 : f32 to vector<8x8xf32>
    %313 = arith.subf %312, %311 : vector<8x8xf32>
    %314 = math.exp %313 : vector<8x8xf32>
    %cst_18 = arith.constant dense<0.000000e+00> : vector<8xf32>
    %315 = vector.multi_reduction <add>, %314, %cst_18 [1] : vector<8x8xf32> to vector<8xf32>
    %316 = vector.shape_cast %315 : vector<8xf32> to vector<8x1xf32>
    %317 = vector.extract_strided_slice %3 {offsets = [0, 40], sizes = [8, 1], strides = [1, 1]} : vector<8x80xf32> to vector<8x1xf32>
    %318 = vector.extract_strided_slice %4 {offsets = [40, 0], sizes = [1, 8], strides = [1, 1]} : vector<80x8xf32> to vector<1x8xf32>
    %319 = vector.broadcast %317 : vector<8x1xf32> to vector<8x8xf32>
    %320 = vector.broadcast %318 : vector<1x8xf32> to vector<8x8xf32>
    %321 = arith.subf %319, %320 : vector<8x8xf32>
    %322 = math.absf %321 : vector<8x8xf32>
    %323 = vector.extract_strided_slice %3 {offsets = [0, 41], sizes = [8, 1], strides = [1, 1]} : vector<8x80xf32> to vector<8x1xf32>
    %324 = vector.extract_strided_slice %4 {offsets = [41, 0], sizes = [1, 8], strides = [1, 1]} : vector<80x8xf32> to vector<1x8xf32>
    %325 = vector.broadcast %323 : vector<8x1xf32> to vector<8x8xf32>
    %326 = vector.broadcast %324 : vector<1x8xf32> to vector<8x8xf32>
    %327 = arith.subf %325, %326 : vector<8x8xf32>
    %328 = math.absf %327 : vector<8x8xf32>
    %329 = arith.addf %322, %328 : vector<8x8xf32>
    %330 = vector.extract_strided_slice %3 {offsets = [0, 42], sizes = [8, 1], strides = [1, 1]} : vector<8x80xf32> to vector<8x1xf32>
    %331 = vector.extract_strided_slice %4 {offsets = [42, 0], sizes = [1, 8], strides = [1, 1]} : vector<80x8xf32> to vector<1x8xf32>
    %332 = vector.broadcast %330 : vector<8x1xf32> to vector<8x8xf32>
    %333 = vector.broadcast %331 : vector<1x8xf32> to vector<8x8xf32>
    %334 = arith.subf %332, %333 : vector<8x8xf32>
    %335 = math.absf %334 : vector<8x8xf32>
    %336 = arith.addf %329, %335 : vector<8x8xf32>
    %337 = vector.extract_strided_slice %3 {offsets = [0, 43], sizes = [8, 1], strides = [1, 1]} : vector<8x80xf32> to vector<8x1xf32>
    %338 = vector.extract_strided_slice %4 {offsets = [43, 0], sizes = [1, 8], strides = [1, 1]} : vector<80x8xf32> to vector<1x8xf32>
    %339 = vector.broadcast %337 : vector<8x1xf32> to vector<8x8xf32>
    %340 = vector.broadcast %338 : vector<1x8xf32> to vector<8x8xf32>
    %341 = arith.subf %339, %340 : vector<8x8xf32>
    %342 = math.absf %341 : vector<8x8xf32>
    %343 = arith.addf %336, %342 : vector<8x8xf32>
    %344 = vector.extract_strided_slice %3 {offsets = [0, 44], sizes = [8, 1], strides = [1, 1]} : vector<8x80xf32> to vector<8x1xf32>
    %345 = vector.extract_strided_slice %4 {offsets = [44, 0], sizes = [1, 8], strides = [1, 1]} : vector<80x8xf32> to vector<1x8xf32>
    %346 = vector.broadcast %344 : vector<8x1xf32> to vector<8x8xf32>
    %347 = vector.broadcast %345 : vector<1x8xf32> to vector<8x8xf32>
    %348 = arith.subf %346, %347 : vector<8x8xf32>
    %349 = math.absf %348 : vector<8x8xf32>
    %350 = arith.addf %343, %349 : vector<8x8xf32>
    %cst_19 = arith.constant 0.000000e+00 : f32
    %351 = vector.broadcast %cst_19 : f32 to vector<8x8xf32>
    %352 = arith.subf %351, %350 : vector<8x8xf32>
    %353 = math.exp %352 : vector<8x8xf32>
    %cst_20 = arith.constant dense<0.000000e+00> : vector<8xf32>
    %354 = vector.multi_reduction <add>, %353, %cst_20 [1] : vector<8x8xf32> to vector<8xf32>
    %355 = vector.shape_cast %354 : vector<8xf32> to vector<8x1xf32>
    %356 = vector.extract_strided_slice %3 {offsets = [0, 45], sizes = [8, 1], strides = [1, 1]} : vector<8x80xf32> to vector<8x1xf32>
    %357 = vector.extract_strided_slice %4 {offsets = [45, 0], sizes = [1, 8], strides = [1, 1]} : vector<80x8xf32> to vector<1x8xf32>
    %358 = vector.broadcast %356 : vector<8x1xf32> to vector<8x8xf32>
    %359 = vector.broadcast %357 : vector<1x8xf32> to vector<8x8xf32>
    %360 = arith.subf %358, %359 : vector<8x8xf32>
    %361 = math.absf %360 : vector<8x8xf32>
    %362 = vector.extract_strided_slice %3 {offsets = [0, 46], sizes = [8, 1], strides = [1, 1]} : vector<8x80xf32> to vector<8x1xf32>
    %363 = vector.extract_strided_slice %4 {offsets = [46, 0], sizes = [1, 8], strides = [1, 1]} : vector<80x8xf32> to vector<1x8xf32>
    %364 = vector.broadcast %362 : vector<8x1xf32> to vector<8x8xf32>
    %365 = vector.broadcast %363 : vector<1x8xf32> to vector<8x8xf32>
    %366 = arith.subf %364, %365 : vector<8x8xf32>
    %367 = math.absf %366 : vector<8x8xf32>
    %368 = arith.addf %361, %367 : vector<8x8xf32>
    %369 = vector.extract_strided_slice %3 {offsets = [0, 47], sizes = [8, 1], strides = [1, 1]} : vector<8x80xf32> to vector<8x1xf32>
    %370 = vector.extract_strided_slice %4 {offsets = [47, 0], sizes = [1, 8], strides = [1, 1]} : vector<80x8xf32> to vector<1x8xf32>
    %371 = vector.broadcast %369 : vector<8x1xf32> to vector<8x8xf32>
    %372 = vector.broadcast %370 : vector<1x8xf32> to vector<8x8xf32>
    %373 = arith.subf %371, %372 : vector<8x8xf32>
    %374 = math.absf %373 : vector<8x8xf32>
    %375 = arith.addf %368, %374 : vector<8x8xf32>
    %376 = vector.extract_strided_slice %3 {offsets = [0, 48], sizes = [8, 1], strides = [1, 1]} : vector<8x80xf32> to vector<8x1xf32>
    %377 = vector.extract_strided_slice %4 {offsets = [48, 0], sizes = [1, 8], strides = [1, 1]} : vector<80x8xf32> to vector<1x8xf32>
    %378 = vector.broadcast %376 : vector<8x1xf32> to vector<8x8xf32>
    %379 = vector.broadcast %377 : vector<1x8xf32> to vector<8x8xf32>
    %380 = arith.subf %378, %379 : vector<8x8xf32>
    %381 = math.absf %380 : vector<8x8xf32>
    %382 = arith.addf %375, %381 : vector<8x8xf32>
    %383 = vector.extract_strided_slice %3 {offsets = [0, 49], sizes = [8, 1], strides = [1, 1]} : vector<8x80xf32> to vector<8x1xf32>
    %384 = vector.extract_strided_slice %4 {offsets = [49, 0], sizes = [1, 8], strides = [1, 1]} : vector<80x8xf32> to vector<1x8xf32>
    %385 = vector.broadcast %383 : vector<8x1xf32> to vector<8x8xf32>
    %386 = vector.broadcast %384 : vector<1x8xf32> to vector<8x8xf32>
    %387 = arith.subf %385, %386 : vector<8x8xf32>
    %388 = math.absf %387 : vector<8x8xf32>
    %389 = arith.addf %382, %388 : vector<8x8xf32>
    %cst_21 = arith.constant 0.000000e+00 : f32
    %390 = vector.broadcast %cst_21 : f32 to vector<8x8xf32>
    %391 = arith.subf %390, %389 : vector<8x8xf32>
    %392 = math.exp %391 : vector<8x8xf32>
    %cst_22 = arith.constant dense<0.000000e+00> : vector<8xf32>
    %393 = vector.multi_reduction <add>, %392, %cst_22 [1] : vector<8x8xf32> to vector<8xf32>
    %394 = vector.shape_cast %393 : vector<8xf32> to vector<8x1xf32>
    %395 = vector.extract_strided_slice %3 {offsets = [0, 50], sizes = [8, 1], strides = [1, 1]} : vector<8x80xf32> to vector<8x1xf32>
    %396 = vector.extract_strided_slice %4 {offsets = [50, 0], sizes = [1, 8], strides = [1, 1]} : vector<80x8xf32> to vector<1x8xf32>
    %397 = vector.broadcast %395 : vector<8x1xf32> to vector<8x8xf32>
    %398 = vector.broadcast %396 : vector<1x8xf32> to vector<8x8xf32>
    %399 = arith.subf %397, %398 : vector<8x8xf32>
    %400 = math.absf %399 : vector<8x8xf32>
    %401 = vector.extract_strided_slice %3 {offsets = [0, 51], sizes = [8, 1], strides = [1, 1]} : vector<8x80xf32> to vector<8x1xf32>
    %402 = vector.extract_strided_slice %4 {offsets = [51, 0], sizes = [1, 8], strides = [1, 1]} : vector<80x8xf32> to vector<1x8xf32>
    %403 = vector.broadcast %401 : vector<8x1xf32> to vector<8x8xf32>
    %404 = vector.broadcast %402 : vector<1x8xf32> to vector<8x8xf32>
    %405 = arith.subf %403, %404 : vector<8x8xf32>
    %406 = math.absf %405 : vector<8x8xf32>
    %407 = arith.addf %400, %406 : vector<8x8xf32>
    %408 = vector.extract_strided_slice %3 {offsets = [0, 52], sizes = [8, 1], strides = [1, 1]} : vector<8x80xf32> to vector<8x1xf32>
    %409 = vector.extract_strided_slice %4 {offsets = [52, 0], sizes = [1, 8], strides = [1, 1]} : vector<80x8xf32> to vector<1x8xf32>
    %410 = vector.broadcast %408 : vector<8x1xf32> to vector<8x8xf32>
    %411 = vector.broadcast %409 : vector<1x8xf32> to vector<8x8xf32>
    %412 = arith.subf %410, %411 : vector<8x8xf32>
    %413 = math.absf %412 : vector<8x8xf32>
    %414 = arith.addf %407, %413 : vector<8x8xf32>
    %415 = vector.extract_strided_slice %3 {offsets = [0, 53], sizes = [8, 1], strides = [1, 1]} : vector<8x80xf32> to vector<8x1xf32>
    %416 = vector.extract_strided_slice %4 {offsets = [53, 0], sizes = [1, 8], strides = [1, 1]} : vector<80x8xf32> to vector<1x8xf32>
    %417 = vector.broadcast %415 : vector<8x1xf32> to vector<8x8xf32>
    %418 = vector.broadcast %416 : vector<1x8xf32> to vector<8x8xf32>
    %419 = arith.subf %417, %418 : vector<8x8xf32>
    %420 = math.absf %419 : vector<8x8xf32>
    %421 = arith.addf %414, %420 : vector<8x8xf32>
    %422 = vector.extract_strided_slice %3 {offsets = [0, 54], sizes = [8, 1], strides = [1, 1]} : vector<8x80xf32> to vector<8x1xf32>
    %423 = vector.extract_strided_slice %4 {offsets = [54, 0], sizes = [1, 8], strides = [1, 1]} : vector<80x8xf32> to vector<1x8xf32>
    %424 = vector.broadcast %422 : vector<8x1xf32> to vector<8x8xf32>
    %425 = vector.broadcast %423 : vector<1x8xf32> to vector<8x8xf32>
    %426 = arith.subf %424, %425 : vector<8x8xf32>
    %427 = math.absf %426 : vector<8x8xf32>
    %428 = arith.addf %421, %427 : vector<8x8xf32>
    %cst_23 = arith.constant 0.000000e+00 : f32
    %429 = vector.broadcast %cst_23 : f32 to vector<8x8xf32>
    %430 = arith.subf %429, %428 : vector<8x8xf32>
    %431 = math.exp %430 : vector<8x8xf32>
    %cst_24 = arith.constant dense<0.000000e+00> : vector<8xf32>
    %432 = vector.multi_reduction <add>, %431, %cst_24 [1] : vector<8x8xf32> to vector<8xf32>
    %433 = vector.shape_cast %432 : vector<8xf32> to vector<8x1xf32>
    %434 = vector.extract_strided_slice %3 {offsets = [0, 55], sizes = [8, 1], strides = [1, 1]} : vector<8x80xf32> to vector<8x1xf32>
    %435 = vector.extract_strided_slice %4 {offsets = [55, 0], sizes = [1, 8], strides = [1, 1]} : vector<80x8xf32> to vector<1x8xf32>
    %436 = vector.broadcast %434 : vector<8x1xf32> to vector<8x8xf32>
    %437 = vector.broadcast %435 : vector<1x8xf32> to vector<8x8xf32>
    %438 = arith.subf %436, %437 : vector<8x8xf32>
    %439 = math.absf %438 : vector<8x8xf32>
    %440 = vector.extract_strided_slice %3 {offsets = [0, 56], sizes = [8, 1], strides = [1, 1]} : vector<8x80xf32> to vector<8x1xf32>
    %441 = vector.extract_strided_slice %4 {offsets = [56, 0], sizes = [1, 8], strides = [1, 1]} : vector<80x8xf32> to vector<1x8xf32>
    %442 = vector.broadcast %440 : vector<8x1xf32> to vector<8x8xf32>
    %443 = vector.broadcast %441 : vector<1x8xf32> to vector<8x8xf32>
    %444 = arith.subf %442, %443 : vector<8x8xf32>
    %445 = math.absf %444 : vector<8x8xf32>
    %446 = arith.addf %439, %445 : vector<8x8xf32>
    %447 = vector.extract_strided_slice %3 {offsets = [0, 57], sizes = [8, 1], strides = [1, 1]} : vector<8x80xf32> to vector<8x1xf32>
    %448 = vector.extract_strided_slice %4 {offsets = [57, 0], sizes = [1, 8], strides = [1, 1]} : vector<80x8xf32> to vector<1x8xf32>
    %449 = vector.broadcast %447 : vector<8x1xf32> to vector<8x8xf32>
    %450 = vector.broadcast %448 : vector<1x8xf32> to vector<8x8xf32>
    %451 = arith.subf %449, %450 : vector<8x8xf32>
    %452 = math.absf %451 : vector<8x8xf32>
    %453 = arith.addf %446, %452 : vector<8x8xf32>
    %454 = vector.extract_strided_slice %3 {offsets = [0, 58], sizes = [8, 1], strides = [1, 1]} : vector<8x80xf32> to vector<8x1xf32>
    %455 = vector.extract_strided_slice %4 {offsets = [58, 0], sizes = [1, 8], strides = [1, 1]} : vector<80x8xf32> to vector<1x8xf32>
    %456 = vector.broadcast %454 : vector<8x1xf32> to vector<8x8xf32>
    %457 = vector.broadcast %455 : vector<1x8xf32> to vector<8x8xf32>
    %458 = arith.subf %456, %457 : vector<8x8xf32>
    %459 = math.absf %458 : vector<8x8xf32>
    %460 = arith.addf %453, %459 : vector<8x8xf32>
    %461 = vector.extract_strided_slice %3 {offsets = [0, 59], sizes = [8, 1], strides = [1, 1]} : vector<8x80xf32> to vector<8x1xf32>
    %462 = vector.extract_strided_slice %4 {offsets = [59, 0], sizes = [1, 8], strides = [1, 1]} : vector<80x8xf32> to vector<1x8xf32>
    %463 = vector.broadcast %461 : vector<8x1xf32> to vector<8x8xf32>
    %464 = vector.broadcast %462 : vector<1x8xf32> to vector<8x8xf32>
    %465 = arith.subf %463, %464 : vector<8x8xf32>
    %466 = math.absf %465 : vector<8x8xf32>
    %467 = arith.addf %460, %466 : vector<8x8xf32>
    %cst_25 = arith.constant 0.000000e+00 : f32
    %468 = vector.broadcast %cst_25 : f32 to vector<8x8xf32>
    %469 = arith.subf %468, %467 : vector<8x8xf32>
    %470 = math.exp %469 : vector<8x8xf32>
    %cst_26 = arith.constant dense<0.000000e+00> : vector<8xf32>
    %471 = vector.multi_reduction <add>, %470, %cst_26 [1] : vector<8x8xf32> to vector<8xf32>
    %472 = vector.shape_cast %471 : vector<8xf32> to vector<8x1xf32>
    %473 = vector.extract_strided_slice %3 {offsets = [0, 60], sizes = [8, 1], strides = [1, 1]} : vector<8x80xf32> to vector<8x1xf32>
    %474 = vector.extract_strided_slice %4 {offsets = [60, 0], sizes = [1, 8], strides = [1, 1]} : vector<80x8xf32> to vector<1x8xf32>
    %475 = vector.broadcast %473 : vector<8x1xf32> to vector<8x8xf32>
    %476 = vector.broadcast %474 : vector<1x8xf32> to vector<8x8xf32>
    %477 = arith.subf %475, %476 : vector<8x8xf32>
    %478 = math.absf %477 : vector<8x8xf32>
    %479 = vector.extract_strided_slice %3 {offsets = [0, 61], sizes = [8, 1], strides = [1, 1]} : vector<8x80xf32> to vector<8x1xf32>
    %480 = vector.extract_strided_slice %4 {offsets = [61, 0], sizes = [1, 8], strides = [1, 1]} : vector<80x8xf32> to vector<1x8xf32>
    %481 = vector.broadcast %479 : vector<8x1xf32> to vector<8x8xf32>
    %482 = vector.broadcast %480 : vector<1x8xf32> to vector<8x8xf32>
    %483 = arith.subf %481, %482 : vector<8x8xf32>
    %484 = math.absf %483 : vector<8x8xf32>
    %485 = arith.addf %478, %484 : vector<8x8xf32>
    %486 = vector.extract_strided_slice %3 {offsets = [0, 62], sizes = [8, 1], strides = [1, 1]} : vector<8x80xf32> to vector<8x1xf32>
    %487 = vector.extract_strided_slice %4 {offsets = [62, 0], sizes = [1, 8], strides = [1, 1]} : vector<80x8xf32> to vector<1x8xf32>
    %488 = vector.broadcast %486 : vector<8x1xf32> to vector<8x8xf32>
    %489 = vector.broadcast %487 : vector<1x8xf32> to vector<8x8xf32>
    %490 = arith.subf %488, %489 : vector<8x8xf32>
    %491 = math.absf %490 : vector<8x8xf32>
    %492 = arith.addf %485, %491 : vector<8x8xf32>
    %493 = vector.extract_strided_slice %3 {offsets = [0, 63], sizes = [8, 1], strides = [1, 1]} : vector<8x80xf32> to vector<8x1xf32>
    %494 = vector.extract_strided_slice %4 {offsets = [63, 0], sizes = [1, 8], strides = [1, 1]} : vector<80x8xf32> to vector<1x8xf32>
    %495 = vector.broadcast %493 : vector<8x1xf32> to vector<8x8xf32>
    %496 = vector.broadcast %494 : vector<1x8xf32> to vector<8x8xf32>
    %497 = arith.subf %495, %496 : vector<8x8xf32>
    %498 = math.absf %497 : vector<8x8xf32>
    %499 = arith.addf %492, %498 : vector<8x8xf32>
    %500 = vector.extract_strided_slice %3 {offsets = [0, 64], sizes = [8, 1], strides = [1, 1]} : vector<8x80xf32> to vector<8x1xf32>
    %501 = vector.extract_strided_slice %4 {offsets = [64, 0], sizes = [1, 8], strides = [1, 1]} : vector<80x8xf32> to vector<1x8xf32>
    %502 = vector.broadcast %500 : vector<8x1xf32> to vector<8x8xf32>
    %503 = vector.broadcast %501 : vector<1x8xf32> to vector<8x8xf32>
    %504 = arith.subf %502, %503 : vector<8x8xf32>
    %505 = math.absf %504 : vector<8x8xf32>
    %506 = arith.addf %499, %505 : vector<8x8xf32>
    %cst_27 = arith.constant 0.000000e+00 : f32
    %507 = vector.broadcast %cst_27 : f32 to vector<8x8xf32>
    %508 = arith.subf %507, %506 : vector<8x8xf32>
    %509 = math.exp %508 : vector<8x8xf32>
    %cst_28 = arith.constant dense<0.000000e+00> : vector<8xf32>
    %510 = vector.multi_reduction <add>, %509, %cst_28 [1] : vector<8x8xf32> to vector<8xf32>
    %511 = vector.shape_cast %510 : vector<8xf32> to vector<8x1xf32>
    %512 = vector.extract_strided_slice %3 {offsets = [0, 65], sizes = [8, 1], strides = [1, 1]} : vector<8x80xf32> to vector<8x1xf32>
    %513 = vector.extract_strided_slice %4 {offsets = [65, 0], sizes = [1, 8], strides = [1, 1]} : vector<80x8xf32> to vector<1x8xf32>
    %514 = vector.broadcast %512 : vector<8x1xf32> to vector<8x8xf32>
    %515 = vector.broadcast %513 : vector<1x8xf32> to vector<8x8xf32>
    %516 = arith.subf %514, %515 : vector<8x8xf32>
    %517 = math.absf %516 : vector<8x8xf32>
    %518 = vector.extract_strided_slice %3 {offsets = [0, 66], sizes = [8, 1], strides = [1, 1]} : vector<8x80xf32> to vector<8x1xf32>
    %519 = vector.extract_strided_slice %4 {offsets = [66, 0], sizes = [1, 8], strides = [1, 1]} : vector<80x8xf32> to vector<1x8xf32>
    %520 = vector.broadcast %518 : vector<8x1xf32> to vector<8x8xf32>
    %521 = vector.broadcast %519 : vector<1x8xf32> to vector<8x8xf32>
    %522 = arith.subf %520, %521 : vector<8x8xf32>
    %523 = math.absf %522 : vector<8x8xf32>
    %524 = arith.addf %517, %523 : vector<8x8xf32>
    %525 = vector.extract_strided_slice %3 {offsets = [0, 67], sizes = [8, 1], strides = [1, 1]} : vector<8x80xf32> to vector<8x1xf32>
    %526 = vector.extract_strided_slice %4 {offsets = [67, 0], sizes = [1, 8], strides = [1, 1]} : vector<80x8xf32> to vector<1x8xf32>
    %527 = vector.broadcast %525 : vector<8x1xf32> to vector<8x8xf32>
    %528 = vector.broadcast %526 : vector<1x8xf32> to vector<8x8xf32>
    %529 = arith.subf %527, %528 : vector<8x8xf32>
    %530 = math.absf %529 : vector<8x8xf32>
    %531 = arith.addf %524, %530 : vector<8x8xf32>
    %532 = vector.extract_strided_slice %3 {offsets = [0, 68], sizes = [8, 1], strides = [1, 1]} : vector<8x80xf32> to vector<8x1xf32>
    %533 = vector.extract_strided_slice %4 {offsets = [68, 0], sizes = [1, 8], strides = [1, 1]} : vector<80x8xf32> to vector<1x8xf32>
    %534 = vector.broadcast %532 : vector<8x1xf32> to vector<8x8xf32>
    %535 = vector.broadcast %533 : vector<1x8xf32> to vector<8x8xf32>
    %536 = arith.subf %534, %535 : vector<8x8xf32>
    %537 = math.absf %536 : vector<8x8xf32>
    %538 = arith.addf %531, %537 : vector<8x8xf32>
    %539 = vector.extract_strided_slice %3 {offsets = [0, 69], sizes = [8, 1], strides = [1, 1]} : vector<8x80xf32> to vector<8x1xf32>
    %540 = vector.extract_strided_slice %4 {offsets = [69, 0], sizes = [1, 8], strides = [1, 1]} : vector<80x8xf32> to vector<1x8xf32>
    %541 = vector.broadcast %539 : vector<8x1xf32> to vector<8x8xf32>
    %542 = vector.broadcast %540 : vector<1x8xf32> to vector<8x8xf32>
    %543 = arith.subf %541, %542 : vector<8x8xf32>
    %544 = math.absf %543 : vector<8x8xf32>
    %545 = arith.addf %538, %544 : vector<8x8xf32>
    %cst_29 = arith.constant 0.000000e+00 : f32
    %546 = vector.broadcast %cst_29 : f32 to vector<8x8xf32>
    %547 = arith.subf %546, %545 : vector<8x8xf32>
    %548 = math.exp %547 : vector<8x8xf32>
    %cst_30 = arith.constant dense<0.000000e+00> : vector<8xf32>
    %549 = vector.multi_reduction <add>, %548, %cst_30 [1] : vector<8x8xf32> to vector<8xf32>
    %550 = vector.shape_cast %549 : vector<8xf32> to vector<8x1xf32>
    %551 = vector.extract_strided_slice %3 {offsets = [0, 70], sizes = [8, 1], strides = [1, 1]} : vector<8x80xf32> to vector<8x1xf32>
    %552 = vector.extract_strided_slice %4 {offsets = [70, 0], sizes = [1, 8], strides = [1, 1]} : vector<80x8xf32> to vector<1x8xf32>
    %553 = vector.broadcast %551 : vector<8x1xf32> to vector<8x8xf32>
    %554 = vector.broadcast %552 : vector<1x8xf32> to vector<8x8xf32>
    %555 = arith.subf %553, %554 : vector<8x8xf32>
    %556 = math.absf %555 : vector<8x8xf32>
    %557 = vector.extract_strided_slice %3 {offsets = [0, 71], sizes = [8, 1], strides = [1, 1]} : vector<8x80xf32> to vector<8x1xf32>
    %558 = vector.extract_strided_slice %4 {offsets = [71, 0], sizes = [1, 8], strides = [1, 1]} : vector<80x8xf32> to vector<1x8xf32>
    %559 = vector.broadcast %557 : vector<8x1xf32> to vector<8x8xf32>
    %560 = vector.broadcast %558 : vector<1x8xf32> to vector<8x8xf32>
    %561 = arith.subf %559, %560 : vector<8x8xf32>
    %562 = math.absf %561 : vector<8x8xf32>
    %563 = arith.addf %556, %562 : vector<8x8xf32>
    %564 = vector.extract_strided_slice %3 {offsets = [0, 72], sizes = [8, 1], strides = [1, 1]} : vector<8x80xf32> to vector<8x1xf32>
    %565 = vector.extract_strided_slice %4 {offsets = [72, 0], sizes = [1, 8], strides = [1, 1]} : vector<80x8xf32> to vector<1x8xf32>
    %566 = vector.broadcast %564 : vector<8x1xf32> to vector<8x8xf32>
    %567 = vector.broadcast %565 : vector<1x8xf32> to vector<8x8xf32>
    %568 = arith.subf %566, %567 : vector<8x8xf32>
    %569 = math.absf %568 : vector<8x8xf32>
    %570 = arith.addf %563, %569 : vector<8x8xf32>
    %571 = vector.extract_strided_slice %3 {offsets = [0, 73], sizes = [8, 1], strides = [1, 1]} : vector<8x80xf32> to vector<8x1xf32>
    %572 = vector.extract_strided_slice %4 {offsets = [73, 0], sizes = [1, 8], strides = [1, 1]} : vector<80x8xf32> to vector<1x8xf32>
    %573 = vector.broadcast %571 : vector<8x1xf32> to vector<8x8xf32>
    %574 = vector.broadcast %572 : vector<1x8xf32> to vector<8x8xf32>
    %575 = arith.subf %573, %574 : vector<8x8xf32>
    %576 = math.absf %575 : vector<8x8xf32>
    %577 = arith.addf %570, %576 : vector<8x8xf32>
    %578 = vector.extract_strided_slice %3 {offsets = [0, 74], sizes = [8, 1], strides = [1, 1]} : vector<8x80xf32> to vector<8x1xf32>
    %579 = vector.extract_strided_slice %4 {offsets = [74, 0], sizes = [1, 8], strides = [1, 1]} : vector<80x8xf32> to vector<1x8xf32>
    %580 = vector.broadcast %578 : vector<8x1xf32> to vector<8x8xf32>
    %581 = vector.broadcast %579 : vector<1x8xf32> to vector<8x8xf32>
    %582 = arith.subf %580, %581 : vector<8x8xf32>
    %583 = math.absf %582 : vector<8x8xf32>
    %584 = arith.addf %577, %583 : vector<8x8xf32>
    %cst_31 = arith.constant 0.000000e+00 : f32
    %585 = vector.broadcast %cst_31 : f32 to vector<8x8xf32>
    %586 = arith.subf %585, %584 : vector<8x8xf32>
    %587 = math.exp %586 : vector<8x8xf32>
    %cst_32 = arith.constant dense<0.000000e+00> : vector<8xf32>
    %588 = vector.multi_reduction <add>, %587, %cst_32 [1] : vector<8x8xf32> to vector<8xf32>
    %589 = vector.shape_cast %588 : vector<8xf32> to vector<8x1xf32>
    %590 = vector.extract_strided_slice %3 {offsets = [0, 75], sizes = [8, 1], strides = [1, 1]} : vector<8x80xf32> to vector<8x1xf32>
    %591 = vector.extract_strided_slice %4 {offsets = [75, 0], sizes = [1, 8], strides = [1, 1]} : vector<80x8xf32> to vector<1x8xf32>
    %592 = vector.broadcast %590 : vector<8x1xf32> to vector<8x8xf32>
    %593 = vector.broadcast %591 : vector<1x8xf32> to vector<8x8xf32>
    %594 = arith.subf %592, %593 : vector<8x8xf32>
    %595 = math.absf %594 : vector<8x8xf32>
    %596 = vector.extract_strided_slice %3 {offsets = [0, 76], sizes = [8, 1], strides = [1, 1]} : vector<8x80xf32> to vector<8x1xf32>
    %597 = vector.extract_strided_slice %4 {offsets = [76, 0], sizes = [1, 8], strides = [1, 1]} : vector<80x8xf32> to vector<1x8xf32>
    %598 = vector.broadcast %596 : vector<8x1xf32> to vector<8x8xf32>
    %599 = vector.broadcast %597 : vector<1x8xf32> to vector<8x8xf32>
    %600 = arith.subf %598, %599 : vector<8x8xf32>
    %601 = math.absf %600 : vector<8x8xf32>
    %602 = arith.addf %595, %601 : vector<8x8xf32>
    %603 = vector.extract_strided_slice %3 {offsets = [0, 77], sizes = [8, 1], strides = [1, 1]} : vector<8x80xf32> to vector<8x1xf32>
    %604 = vector.extract_strided_slice %4 {offsets = [77, 0], sizes = [1, 8], strides = [1, 1]} : vector<80x8xf32> to vector<1x8xf32>
    %605 = vector.broadcast %603 : vector<8x1xf32> to vector<8x8xf32>
    %606 = vector.broadcast %604 : vector<1x8xf32> to vector<8x8xf32>
    %607 = arith.subf %605, %606 : vector<8x8xf32>
    %608 = math.absf %607 : vector<8x8xf32>
    %609 = arith.addf %602, %608 : vector<8x8xf32>
    %610 = vector.extract_strided_slice %3 {offsets = [0, 78], sizes = [8, 1], strides = [1, 1]} : vector<8x80xf32> to vector<8x1xf32>
    %611 = vector.extract_strided_slice %4 {offsets = [78, 0], sizes = [1, 8], strides = [1, 1]} : vector<80x8xf32> to vector<1x8xf32>
    %612 = vector.broadcast %610 : vector<8x1xf32> to vector<8x8xf32>
    %613 = vector.broadcast %611 : vector<1x8xf32> to vector<8x8xf32>
    %614 = arith.subf %612, %613 : vector<8x8xf32>
    %615 = math.absf %614 : vector<8x8xf32>
    %616 = arith.addf %609, %615 : vector<8x8xf32>
    %617 = vector.extract_strided_slice %3 {offsets = [0, 79], sizes = [8, 1], strides = [1, 1]} : vector<8x80xf32> to vector<8x1xf32>
    %618 = vector.extract_strided_slice %4 {offsets = [79, 0], sizes = [1, 8], strides = [1, 1]} : vector<80x8xf32> to vector<1x8xf32>
    %619 = vector.broadcast %617 : vector<8x1xf32> to vector<8x8xf32>
    %620 = vector.broadcast %618 : vector<1x8xf32> to vector<8x8xf32>
    %621 = arith.subf %619, %620 : vector<8x8xf32>
    %622 = math.absf %621 : vector<8x8xf32>
    %623 = arith.addf %616, %622 : vector<8x8xf32>
    %cst_33 = arith.constant 0.000000e+00 : f32
    %624 = vector.broadcast %cst_33 : f32 to vector<8x8xf32>
    %625 = arith.subf %624, %623 : vector<8x8xf32>
    %626 = math.exp %625 : vector<8x8xf32>
    %cst_34 = arith.constant dense<0.000000e+00> : vector<8xf32>
    %627 = vector.multi_reduction <add>, %626, %cst_34 [1] : vector<8x8xf32> to vector<8xf32>
    %628 = vector.shape_cast %627 : vector<8xf32> to vector<8x1xf32>
    %c0_35 = arith.constant 0 : index
    %c0_36 = arith.constant 0 : index
    %629 = vector.load %arg4[%c0_35, %c0_36] : memref<8x16xf32, #tpu.memory_space<vmem>>, vector<8x16xf32>
    %630 = tpu.concatenate %43, %82, %121, %160, %199, %238, %277, %316, %355, %394, %433, %472, %511, %550, %589, %628 in 1 : vector<8x1xf32>, vector<8x1xf32>, vector<8x1xf32>, vector<8x1xf32>, vector<8x1xf32>, vector<8x1xf32>, vector<8x1xf32>, vector<8x1xf32>, vector<8x1xf32>, vector<8x1xf32>, vector<8x1xf32>, vector<8x1xf32>, vector<8x1xf32>, vector<8x1xf32>, vector<8x1xf32>, vector<8x1xf32> -> vector<8x16xf32>
    %631 = arith.addf %629, %630 : vector<8x16xf32>
    %c0_37 = arith.constant 0 : index
    %c0_38 = arith.constant 0 : index
    %632 = vector.load %arg4[%c0_37, %c0_38] : memref<8x16xf32, #tpu.memory_space<vmem>>, vector<8x16xf32>
    tpu.vector_store %arg4[%c0_37, %c0_38], %631 {strides = array<i32>} : memref<8x16xf32, #tpu.memory_space<vmem>>, vector<8x16xf32>,
    return
  }
  func.func @transform_0(%arg0: i32, %arg1: i32) -> (i32, i32) {
    %c0_i32 = arith.constant 0 : i32
    %c0_i32_0 = arith.constant 0 : i32
    return %arg0, %c0_i32 : i32, i32
  }
  func.func @transform_1(%arg0: i32, %arg1: i32) -> (i32, i32) {
    %c0_i32 = arith.constant 0 : i32
    %c0_i32_0 = arith.constant 0 : i32
    return %c0_i32, %arg1 : i32, i32
  }
  func.func @transform_2(%arg0: i32, %arg1: i32) -> (i32, i32) {
    %c0_i32 = arith.constant 0 : i32
    %c0_i32_0 = arith.constant 0 : i32
    return %arg0, %c0_i32 : i32, i32
  }
}

</mosaic_0001>

<bundles_post_ra>
// kernel: tpu_custom_call.1
= control target key start
LH: loop header
LB: loop body
LE: loop exit
PB: predicated region body
PF: predicated region fallthrough
CT: control target
= control target key end

     0   :  { %v1258_v1 = vmov 2   ;;  %v1259_v2 = vmov 0   ;;  %s1702_s0 = inlined_call_operand.vmem [shape: f32[8,80], index: 0, kind: input, shape index: {}]   ;;  %s1703_s1 = inlined_call_operand.vmem [shape: f32[80,8], index: 1, kind: input, shape index: {}]   ;;  %s1704_s2 = inlined_call_operand.hbm [shape: f32[8,16], index: 2, kind: output, shape index: {}]  }
   0x1   :  { %v1358_v0 = vld [vmem:[%s1702_s0] sm:$0xff]  ;;  %1122 = vset.pattern.permute.xlu1 %v1258_v1  ;;  %1120 = vset.pattern.permute.xlu0 %v1259_v2 }
   0x2   :  { %7 = vsyncpa [#allocation3], 0  ;;  %52 = vperm.xlu1 %1122, %v1358_v0   ;;  %31 = vperm.xlu0 %1120, %v1358_v0   ;;  %v1260_v3 = vmov 3   ;;  %v1261_v4 = vmov 1   ;;  %v1262_v5 = vmov 4   ;;  %v1263_v6 = vmov 10  }
   0x3   :  { %v1264_v7 = vmov 5   ;;  %v1265_v8 = vmov 13   ;;  %v1266_v9 = vmov 6   ;;  %v1267_v10 = vmov 15   ;;  %v19_v31 = vld [vmem:[%s1703_s1] sm:$0xff] }
   0x4   :  { %v1268_v11 = vmov 7   ;;  %v1269_v12 = vmov 16   ;;  %v1270_v13 = vmov 8   ;;  %v1271_v14 = vmov 17  }
   0x5   :  { %v1272_v15 = vmov 9   ;;  %v1273_v16 = vmov 18   ;;  %v1274_v17 = vmov 11   ;;  %v1275_v18 = vmov 19  }
   0x6   :  { %1123 = vset.pattern.permute.xlu1 %v1260_v3  ;;  %1121 = vset.pattern.permute.xlu0 %v1261_v4  ;;  %v1276_v19 = vmov 12   ;;  %v1277_v20 = vmov 21   ;;  %v1278_v21 = vmov 14   ;;  %v1279_v22 = vmov 22  }
   0x7   :  { %63 = vperm.xlu1 %1123, %v1358_v0   ;;  %41 = vperm.xlu0 %1121, %v1358_v0   ;;  %v1280_v23 = vmov 20   ;;  %v1281_v24 = vmov 24   ;;  %v1282_v25 = vmov 23   ;;  %v1283_v26 = vmov 25  }
   0x8   :  { %v1284_v27 = vmov 29   ;;  %v34_v28 = vlaneseq  ;;  %vm87_vm0 = vcmask 64512   ;;  %vm992_vm1 = vcmask 7168  }
   0x9   :  { %vm994_vm2 = vcmask 15360   ;;  %vm996_vm3 = vcmask 23552   ;;  %vm998_vm4 = vcmask 31744   ;;  %vm1000_vm5 = vcmask 39936  }
   0xa   :  { %v35_v29 = vshrl.u32 %v34_v28, 7  ;;  %vm1002_vm6 = vcmask 48128   ;;  %vm1004_vm7 = vcmask 56320   ;;  %vm1007_vm8 = vcmask 72704  }
   0xb   :  { %1124 = vset.pattern.permute.xlu1 %v1262_v5  ;;  %1130 = vset.pattern.permute.xlu0 %v1263_v6  ;;  %vm1009_vm9 = vcmask 80896   ;;  %vm1011_vm10 = vcmask 89088   ;;  %vm1013_vm11 = vcmask 97280   ;;  %vm16_vm12 = vcmask 130048  }
   0xc   :  { %74 = vperm.xlu1 %1124, %v1358_v0   ;;  %152 = vperm.xlu0 %1130, %v1358_v0   ;;  %v1385_v30 = vsub.s32 0, %v35_v29  ;;  %v1390_v32 = vsub.s32 2, %v35_v29  ;;  %v1393_v34 = vsub.s32 1, %v35_v29  ;;  %v1395_v37 = vsub.s32 3, %v35_v29 }
   0xd   :  { %v1399_v41 = vsub.s32 4, %v35_v29  ;;  %v1407_v1 = vsub.s32 6, %v35_v29  ;;  %v1409_v3 = vsub.s32 5, %v35_v29  ;;  %v1411_v5 = vsub.s32 7, %v35_v29 }
   0xe   :  { %v37_v33 = vrot.slane %v19_v31, %v1385_v30  ;;  %v58_v38 = vrot.slane %v19_v31, %v1390_v32  ;;  %v47_v40 = vrot.slane %v19_v31, %v1393_v34  ;;  %v69_v42 = vrot.slane %v19_v31, %v1395_v37 }
   0xf   :  { %v80_v48 = vrot.slane %v19_v31, %v1399_v41  ;;  %vm1015_vm13 = vcmask 105472   ;;  %vm1017_vm14 = vcmask 113664   ;;  %vm1019_vm15 = vcmask 121856  }
  0x10   :  { %1125 = vset.pattern.permute.xlu1 %v1264_v7  ;;  %1133 = vset.pattern.permute.xlu0 %v1265_v8  ;;  %v108_v7 = vrot.slane %v19_v31, %v1407_v1  ;;  %v98_v8 = vrot.slane %v19_v31, %v1409_v3 }
  0x11   :  { %92 = vperm.xlu1 %1125, %v1358_v0   ;;  %184 = vperm.xlu0 %1133, %v1358_v0  }
  0x15   :  { %1126 = vset.pattern.permute.xlu1 %v1266_v9  ;;  %1135 = vset.pattern.permute.xlu0 %v1267_v10  ;;  %v119_v9 = vrot.slane %v19_v31, %v1411_v5 }
  0x16   :  { %102 = vperm.xlu1 %1126, %v1358_v0   ;;  %212 = vperm.xlu0 %1135, %v1358_v0  }
  0x1a   :  { %1127 = vset.pattern.permute.xlu1 %v1268_v11  ;;  %1136 = vset.pattern.permute.xlu0 %v1269_v12  ;;  %v1419_v12 = vld [vmem:[%s1703_s1 + $0x8] sm:$0xff] }
  0x1b   :  { %113 = vperm.xlu1 %1127, %v1358_v0   ;;  %222 = vperm.xlu0 %1136, %v1358_v0  }
  0x1f   :  { %1128 = vset.pattern.permute.xlu1 %v1270_v13  ;;  %1137 = vset.pattern.permute.xlu0 %v1271_v14  ;;  %v130_v14 = vrot.slane %v1419_v12, %v1385_v30 }
  0x20   :  { %124 = vperm.xlu1 %1128, %v1358_v0   ;;  %233 = vperm.xlu0 %1137, %v1358_v0  }
  0x24   :  { %1129 = vset.pattern.permute.xlu1 %v1272_v15  ;;  %1138 = vset.pattern.permute.xlu0 %v1273_v16 }
  0x25   :  { %135 = vperm.xlu1 %1129, %v1358_v0   ;;  %244 = vperm.xlu0 %1138, %v1358_v0  }
  0x29   :  { %1131 = vset.pattern.permute.xlu1 %v1274_v17  ;;  %1139 = vset.pattern.permute.xlu0 %v1275_v18  ;;  %v1426_v17 = vld [vmem:[%s1703_s1 + $0x10] sm:$0xff] }
  0x2a   :  { %162 = vperm.xlu1 %1131, %v1358_v0   ;;  %255 = vperm.xlu0 %1139, %v1358_v0  }
  0x2e   :  { %1132 = vset.pattern.permute.xlu1 %v1276_v19  ;;  %1141 = vset.pattern.permute.xlu0 %v1277_v20 }
  0x2f   :  { %173 = vperm.xlu1 %1132, %v1358_v0   ;;  %282 = vperm.xlu0 %1141, %v1358_v0  }
  0x33   :  { %1134 = vset.pattern.permute.xlu1 %v1278_v21  ;;  %1142 = vset.pattern.permute.xlu0 %v1279_v22  ;;  %v218_v21 = vrot.slane %v1419_v12, %v1411_v5  ;;  %v228_v22 = vrot.slane %v1426_v17, %v1385_v30 }
  0x34   :  { %195 = vperm.xlu1 %1134, %v1358_v0   ;;  %293 = vperm.xlu0 %1142, %v1358_v0  }
  0x38   :  { %1140 = vset.pattern.permute.xlu1 %v1280_v23  ;;  %1144 = vset.pattern.permute.xlu0 %v1281_v24 }
  0x39   :  { %272 = vperm.xlu1 %1140, %v1358_v0   ;;  %315 = vperm.xlu0 %1144, %v1358_v0  }
  0x3d   :  { %1143 = vset.pattern.permute.xlu1 %v1282_v25  ;;  %1145 = vset.pattern.permute.xlu0 %v1283_v26 }
  0x3e   :  { %304 = vperm.xlu1 %1143, %v1358_v0  }
  0x42   :  { %1149 = vset.pattern.permute.xlu1 %v1284_v27  ;;  %v141_v27 = vrot.slane %v1419_v12, %v1393_v34 }
  0x81   :  { %v53_v35 = vpop.permute.xlu1 %52  ;;  %v32_v36 = vpop.permute.xlu0 %31 }
  0x82   :  { %v38_v39 = vsub.f32 %v32_v36, %v37_v33  ;;  %v59_v45 = vsub.f32 %v53_v35, %v58_v38  ;;  %v239_v36 = vrot.slane %v1426_v17, %v1393_v34 }
  0x84   :  { %v39_v46 = vand.u32 2147483647, %v38_v39  ;;  %v60_v51 = vand.u32 2147483647, %v59_v45  ;;  %v158_v45 = vrot.slane %v1419_v12, %v1390_v32 }
  0x86   :  { %v64_v43 = vpop.permute.xlu1 %63  ;;  %v42_v44 = vpop.permute.xlu0 %41 }
  0x87   :  { %v48_v47 = vsub.f32 %v42_v44, %v47_v40  ;;  %v70_v49 = vsub.f32 %v64_v43, %v69_v42  ;;  %v250_v43 = vrot.slane %v1426_v17, %v1390_v32  ;;  %v168_v44 = vrot.slane %v1419_v12, %v1395_v37 }
  0x89   :  { %v49_v50 = vand.u32 2147483647, %v48_v47  ;;  %v71_v56 = vand.u32 2147483647, %v70_v49 }
  0x8b   :  { %v50_v52 = vadd.f32 %v49_v50, %v39_v46  ;;  %v75_v53 = vpop.permute.xlu1 %74  ;;  %v1403_v54 = vpop.permute.xlu0 %152 }
  0x8c   :  { %v81_v55 = vsub.f32 %v75_v53, %v80_v48 }
  0x8d   :  { %v61_v57 = vadd.f32 %v60_v51, %v50_v52  ;;  %v261_v51 = vrot.slane %v1426_v17, %v1395_v37 }
  0x8e   :  { %v82_v58 = vand.u32 2147483647, %v81_v55 }
  0x8f   :  { %v72_v59 = vadd.f32 %v71_v56, %v61_v57 }
  0x90   :  { %v93_v60 = vpop.permute.xlu1 %92  ;;  %v1405_v61 = vpop.permute.xlu0 %184 }
  0x91   :  { %v83_v62 = vadd.f32 %v82_v58, %v72_v59  ;;  %v99_v15 = vsub.f32 %v93_v60, %v98_v8  ;;  %v159_v58 = vsub.f32 %v1403_v54, %v158_v45  ;;  %v190_v59 = vrot.slane %v1419_v12, %v1409_v3 }
  0x93   :  { %v84_v63 = vsub.f32 0.0, %v83_v62  ;;  %v100_v25 = vand.u32 2147483647, %v99_v15  ;;  %v179_v62 = vrot.slane %v1419_v12, %v1399_v41 }
  0x95   :  { %v85_v2 = vmul.f32 1.442695, %v84_v63  ;;  %v103_v4 = vpop.permute.xlu1 %102  ;;  %v213_v6 = vpop.permute.xlu0 %212 }
  0x96   :  { %v109_v13 = vsub.f32 %v103_v4, %v108_v7  ;;  %v219_v33 = vsub.f32 %v213_v6, %v218_v21 }
  0x97   :  { %1201 = vpow2.f32 %v85_v2 }
  0x98   :  { %v110_v18 = vand.u32 2147483647, %v109_v13  ;;  %v220_v48 = vand.u32 2147483647, %v219_v33  ;;  %v191_v13 = vsub.f32 %v1405_v61, %v190_v59 }
  0x9a   :  { %v114_v10 = vpop.permute.xlu1 %113  ;;  %v223_v11 = vpop.permute.xlu0 %222  ;;  %v111_v29 = vadd.f32 %v110_v18, %v100_v25  ;;  %v192_v21 = vand.u32 2147483647, %v191_v13  ;;  %v299_v25 = vrot.slane %v1426_v17, %v1407_v1 }
  0x9b   :  { %v120_v16 = vsub.f32 %v114_v10, %v119_v9  ;;  %v229_v35 = vsub.f32 %v223_v11, %v228_v22  ;;  %v160_v11 = vand.u32 2147483647, %v159_v58 }
  0x9d   :  { %v121_v26 = vand.u32 2147483647, %v120_v16  ;;  %v230_v49 = vand.u32 2147483647, %v229_v35  ;;  %v201_v16 = vrot.slane %v1419_v12, %v1407_v1  ;;  %v1462_v12 = vld [vmem:[%s1703_s1 + $0x18] sm:$0xff] }
  0x9f   :  { %v125_v19 = vpop.permute.xlu1 %124  ;;  %v234_v20 = vpop.permute.xlu0 %233  ;;  %v122_v40 = vadd.f32 %v121_v26, %v111_v29  ;;  %v231_v63 = vadd.f32 %v230_v49, %v220_v48  ;;  %v278_v29 = vrot.slane %v1426_v17, %v1399_v41 }
  0xa0   :  { %v131_v23 = vsub.f32 %v125_v19, %v130_v14  ;;  %v240_v50 = vsub.f32 %v234_v20, %v239_v36 }
  0xa1   :  { %v1202_v24 = vpop.eup %1201 }
  0xa2   :  { %v88_v28 = vsel %vm87_vm0, %v1202_v24, 0.0  ;;  %v132_v31 = vand.u32 2147483647, %v131_v23  ;;  %v241_v2 = vand.u32 2147483647, %v240_v50  ;;  %v288_v24 = vrot.slane %v1426_v17, %v1409_v3 }
  0xa3   :  { %89 = vadd.xlane.f32.xlu0 %v88_v28 }
  0xa4   :  { %v136_v38 = vpop.permute.xlu1 %135  ;;  %v245_v39 = vpop.permute.xlu0 %244  ;;  %v133_v46 = vadd.f32 %v132_v31, %v122_v40  ;;  %v242_v14 = vadd.f32 %v241_v2, %v231_v63  ;;  %v321_v40 = vrot.slane %v1462_v12, %v1385_v30  ;;  %v1286_v63 = vmov 27  }
  0xa5   :  { %v142_v42 = vsub.f32 %v136_v38, %v141_v27  ;;  %v251_v56 = vsub.f32 %v245_v39, %v250_v43 }
  0xa7   :  { %v143_v47 = vand.u32 2147483647, %v142_v42  ;;  %v252_v8 = vand.u32 2147483647, %v251_v56 }
  0xa9   :  { %v144_v52 = vadd.f32 %v143_v47, %v133_v46  ;;  %v163_v53 = vpop.permute.xlu1 %162  ;;  %v256_v55 = vpop.permute.xlu0 %255  ;;  %v253_v20 = vadd.f32 %v252_v8, %v242_v14  ;;  %v310_v47 = vrot.slane %v1426_v17, %v1411_v5  ;;  %v1288_v14 = vmov 30  }
  0xaa   :  { %v169_v57 = vsub.f32 %v163_v53, %v168_v44  ;;  %v262_v4 = vsub.f32 %v256_v55, %v261_v51 }
  0xab   :  { %v145_v60 = vsub.f32 0.0, %v144_v52 }
  0xac   :  { %v170_v7 = vand.u32 2147483647, %v169_v57  ;;  %v263_v15 = vand.u32 2147483647, %v262_v4  ;;  %v1285_v57 = vmov 26  }
  0xad   :  { %v146_v6 = vmul.f32 1.442695, %v145_v60 }
  0xae   :  { %v174_v9 = vpop.permute.xlu1 %173  ;;  %v283_v10 = vpop.permute.xlu0 %282  ;;  %v171_v18 = vadd.f32 %v170_v7, %v160_v11  ;;  %v264_v26 = vadd.f32 %v263_v15, %v253_v20  ;;  %v1289_v15 = vmov 31  }
  0xaf   :  { %1203 = vpow2.f32 %v146_v6  ;;  %v180_v54 = vsub.f32 %v174_v9, %v179_v62  ;;  %v289_v33 = vsub.f32 %v283_v10, %v288_v24  ;;  %v1287_v6 = vmov 28  }
  0xb0   :  { %v265_v36 = vsub.f32 0.0, %v264_v26 }
  0xb1   :  { %v181_v19 = vand.u32 2147483647, %v180_v54  ;;  %v290_v48 = vand.u32 2147483647, %v289_v33  ;;  %v359_v33 = vrot.slane %v1462_v12, %v1395_v37 }
  0xb2   :  { %v266_v51 = vmul.f32 1.442695, %v265_v36 }
  0xb3   :  { %v182_v22 = vadd.f32 %v181_v19, %v171_v18  ;;  %v196_v23 = vpop.permute.xlu1 %195  ;;  %v294_v61 = vpop.permute.xlu0 %293  ;;  %v1291_v18 = vmov 34   ;;  %v1292_v19 = vmov 33  }
  0xb4   :  { %v202_v27 = vsub.f32 %v196_v23, %v201_v16  ;;  %v300_v35 = vsub.f32 %v294_v61, %v299_v25  ;;  %v1290_v16 = vmov 32   ;;  %v338_v25 = vrot.slane %v1462_v12, %v1393_v34 }
  0xb5   :  { %v193_v28 = vadd.f32 %v192_v21, %v182_v22  ;;  %v348_v61 = vrot.slane %v1462_v12, %v1390_v32 }
  0xb6   :  { %v203_v31 = vand.u32 2147483647, %v202_v27  ;;  %v301_v50 = vand.u32 2147483647, %v300_v35 }
  0xb8   :  { %v204_v38 = vadd.f32 %v203_v31, %v193_v28  ;;  %v273_v39 = vpop.permute.xlu1 %272  ;;  %v316_v44 = vpop.permute.xlu0 %315 }
  0xb9   :  { %v1204_v42 = vpop.eup %1203  ;;  %v279_v43 = vsub.f32 %v273_v39, %v278_v29  ;;  %332 = vperm.xlu0 %1145, %v1358_v0   ;;  %v322_v53 = vsub.f32 %v316_v44, %v321_v40 }
  0xba   :  { %v205_v45 = vsub.f32 0.0, %v204_v38  ;;  %v148_v46 = vsel %vm87_vm0, %v1204_v42, 0.0  ;;  %v370_v42 = vrot.slane %v1462_v12, %v1399_v41 }
  0xbb   :  { %v280_v49 = vand.u32 2147483647, %v279_v43  ;;  %149 = vadd.xlane.f32.xlu1 %v148_v46  ;;  %v323_v62 = vand.u32 2147483647, %v322_v53 }
  0xbc   :  { %v206_v52 = vmul.f32 1.442695, %v205_v45 }
  0xbd   :  { %v291_v55 = vadd.f32 %v290_v48, %v280_v49  ;;  %v305_v56 = vpop.permute.xlu1 %304  ;;  %1146 = vset.pattern.permute.xlu0 %v1285_v57  ;;  %v381_v49 = vrot.slane %v1462_v12, %v1409_v3 }
  0xbe   :  { %1205 = vpow2.f32 %v206_v52  ;;  %v311_v58 = vsub.f32 %v305_v56, %v310_v47  ;;  %342 = vperm.xlu0 %1146, %v1358_v0  }
  0xbf   :  { %v302_v59 = vadd.f32 %v301_v50, %v291_v55  ;;  %1207 = vpow2.f32 %v266_v51 }
  0xc0   :  { %v312_v60 = vand.u32 2147483647, %v311_v58 }
  0xc2   :  { %v313_v17 = vadd.f32 %v312_v60, %v302_v59  ;;  %1147 = vset.pattern.permute.xlu0 %v1286_v63  ;;  %v1294_v63 = vmov 35  }
  0xc3   :  { %353 = vperm.xlu0 %1147, %v1358_v0  }
  0xc4   :  { %v324_v2 = vadd.f32 %v323_v62, %v313_v17  ;;  %v1293_v17 = vmov 36  }
  0xc6   :  { %v325_v4 = vsub.f32 0.0, %v324_v2  ;;  %v1295_v2 = vmov 37  }
  0xc7   :  { %1148 = vset.pattern.permute.xlu0 %v1287_v6 }
  0xc8   :  { %v1206_v7 = vpop.eup %1205  ;;  %v326_v8 = vmul.f32 1.442695, %v325_v4  ;;  %364 = vperm.xlu0 %1148, %v1358_v0  }
  0xc9   :  { %v208_v9 = vsel %vm87_vm0, %v1206_v7, 0.0  ;;  %v1208_v10 = vpop.eup %1207  ;;  %v398_v7 = vrot.slane %v1462_v12, %v1407_v1 }
  0xca   :  { %1209 = vpow2.f32 %v326_v8  ;;  %209 = vadd.xlane.f32.xlu1 %v208_v9  ;;  %v268_v11 = vsel %vm87_vm0, %v1208_v10, 0.0  ;;  %v408_v8 = vrot.slane %v1462_v12, %v1411_v5  ;;  %v1502_v9 = vld [vmem:[%s1703_s1 + $0x20] sm:$0xff] }
  0xcc   :  { %1154 = vset.pattern.permute.xlu0 %v1291_v18  ;;  %v430_v18 = vrot.slane %v1502_v9, %v1393_v34 }
  0xce   :  { %269 = vadd.xlane.f32.xlu1 %v268_v11 }
  0xd4   :  { %v1210_v13 = vpop.eup %1209 }
  0xd5   :  { %v328_v54 = vsel %vm87_vm0, %v1210_v13, 0.0 }
  0xd6   :  { %329 = vadd.xlane.f32.xlu1 %v328_v54  ;;  %v419_v54 = vrot.slane %v1502_v9, %v1385_v30 }
  0xe7   :  { %375 = vperm.xlu1 %1149, %v1358_v0  }
  0xeb   :  { %1150 = vset.pattern.permute.xlu1 %v1288_v14 }
  0xec   :  { %392 = vperm.xlu1 %1150, %v1358_v0  }
  0xf0   :  { %1151 = vset.pattern.permute.xlu1 %v1289_v15 }
  0xf1   :  { %402 = vperm.xlu1 %1151, %v1358_v0  }
  0xf5   :  { %1152 = vset.pattern.permute.xlu1 %v1290_v16 }
  0xf6   :  { %413 = vperm.xlu1 %1152, %v1358_v0  }
  0xfa   :  { %1153 = vset.pattern.permute.xlu1 %v1292_v19 }
  0xfb   :  { %424 = vperm.xlu1 %1153, %v1358_v0  }
  0xff   :  { %1155 = vset.pattern.permute.xlu1 %v1294_v63 }
 0x130   :  { %v90_v20 = vpop.xlane.xlu0 %89 }
 0x138   :  { %v333_v23 = vpop.permute.xlu0 %332 }
 0x139   :  { %v339_v29 = vsub.f32 %v333_v23, %v338_v25 }
 0x13b   :  { %v340_v38 = vand.u32 2147483647, %v339_v29 }
 0x13d   :  { %v343_v24 = vpop.permute.xlu0 %342 }
 0x13e   :  { %v349_v31 = vsub.f32 %v343_v24, %v348_v61  ;;  %v441_v24 = vrot.slane %v1502_v9, %v1390_v32 }
 0x140   :  { %v350_v39 = vand.u32 2147483647, %v349_v31 }
 0x142   :  { %v354_v28 = vpop.permute.xlu0 %353  ;;  %v351_v44 = vadd.f32 %v350_v39, %v340_v38  ;;  %v1296_v39 = vmov 38  }
 0x143   :  { %v360_v40 = vsub.f32 %v354_v28, %v359_v33 }
 0x145   :  { %v361_v45 = vand.u32 2147483647, %v360_v40  ;;  %v1297_v40 = vmov 39  }
 0x147   :  { %v365_v43 = vpop.permute.xlu0 %364  ;;  %v362_v50 = vadd.f32 %v361_v45, %v351_v44  ;;  %v1300_v44 = vmov 42   ;;  %v1301_v45 = vmov 43  }
 0x148   :  { %v150_v21 = vpop.xlane.xlu1 %149  ;;  %v371_v46 = vsub.f32 %v365_v43, %v370_v42  ;;  %v1298_v42 = vmov 40   ;;  %v1299_v43 = vmov 41  }
 0x149   :  { %v993_v22 = vsel %vm992_vm1, %v90_v20, %v150_v21 }
 0x14a   :  { %v372_v51 = vand.u32 2147483647, %v371_v46  ;;  %v1302_v46 = vmov 44  }
 0x14c   :  { %v373_v55 = vadd.f32 %v372_v51, %v362_v50  ;;  %v468_v50 = vrot.slane %v1502_v9, %v1399_v41 }
 0x157   :  { %v210_v26 = vpop.xlane.xlu1 %209 }
 0x158   :  { %v995_v27 = vsel %vm994_vm2, %v993_v22, %v210_v26 }
 0x15b   :  { %v270_v35 = vpop.xlane.xlu1 %269 }
 0x15c   :  { %v997_v36 = vsel %vm996_vm3, %v995_v27, %v270_v35 }
 0x163   :  { %v330_v47 = vpop.xlane.xlu1 %329 }
 0x164   :  { %v999_v48 = vsel %vm998_vm4, %v997_v36, %v330_v47  ;;  %v1303_v47 = vmov 45  }
 0x167   :  { %v376_v52 = vpop.permute.xlu1 %375 }
 0x168   :  { %v382_v53 = vsub.f32 %v376_v52, %v381_v49  ;;  %v479_v52 = vrot.slane %v1502_v9, %v1409_v3 }
 0x16a   :  { %v383_v56 = vand.u32 2147483647, %v382_v53 }
 0x16b   :  { %v393_v4 = vpop.permute.xlu1 %392 }
 0x16c   :  { %v384_v57 = vadd.f32 %v383_v56, %v373_v55  ;;  %v399_v11 = vsub.f32 %v393_v4, %v398_v7  ;;  %v458_v56 = vrot.slane %v1502_v9, %v1395_v37 }
 0x16e   :  { %v385_v58 = vsub.f32 0.0, %v384_v57  ;;  %v400_v14 = vand.u32 2147483647, %v399_v11 }
 0x170   :  { %v386_v59 = vmul.f32 1.442695, %v385_v58  ;;  %v403_v6 = vpop.permute.xlu1 %402 }
 0x171   :  { %v409_v13 = vsub.f32 %v403_v6, %v408_v8  ;;  %v501_v8 = vrot.slane %v1502_v9, %v1411_v5 }
 0x172   :  { %1211 = vpow2.f32 %v386_v59 }
 0x173   :  { %v410_v15 = vand.u32 2147483647, %v409_v13 }
 0x175   :  { %v414_v10 = vpop.permute.xlu1 %413  ;;  %v411_v21 = vadd.f32 %v410_v15, %v400_v14 }
 0x176   :  { %v420_v16 = vsub.f32 %v414_v10, %v419_v54 }
 0x178   :  { %v421_v22 = vand.u32 2147483647, %v420_v16 }
 0x17a   :  { %v425_v19 = vpop.permute.xlu1 %424  ;;  %v422_v25 = vadd.f32 %v421_v22, %v411_v21  ;;  %v1534_v21 = vld [vmem:[%s1703_s1 + $0x28] sm:$0xff] }
 0x17b   :  { %v431_v23 = vsub.f32 %v425_v19, %v430_v18  ;;  %v518_v22 = vrot.slane %v1534_v21, %v1385_v30 }
 0x17c   :  { %v1212_v60 = vpop.eup %1211 }
 0x17d   :  { %v388_v62 = vsel %vm87_vm0, %v1212_v60, 0.0  ;;  %v432_v61 = vand.u32 2147483647, %v431_v23  ;;  %v539_v23 = vrot.slane %v1534_v21, %v1390_v32 }
 0x17e   :  { %389 = vadd.xlane.f32.xlu0 %v388_v62 }
 0x17f   :  { %v433_v28 = vadd.f32 %v432_v61, %v422_v25  ;;  %v550_v61 = vrot.slane %v1534_v21, %v1395_v37 }
 0x194   :  { %435 = vperm.xlu0 %1154, %v1358_v0  }
 0x198   :  { %1156 = vset.pattern.permute.xlu0 %v1293_v17  ;;  %v490_v17 = vrot.slane %v1502_v9, %v1407_v1  ;;  %v528_v9 = vrot.slane %v1534_v21, %v1393_v34 }
 0x199   :  { %462 = vperm.xlu0 %1156, %v1358_v0  }
 0x19d   :  { %1157 = vset.pattern.permute.xlu0 %v1295_v2 }
 0x19e   :  { %473 = vperm.xlu0 %1157, %v1358_v0  }
 0x1a2   :  { %1165 = vset.pattern.permute.xlu0 %v1303_v47 }
 0x20b   :  { %v390_v12 = vpop.xlane.xlu0 %389 }
 0x20c   :  { %v1001_v20 = vsel %vm1000_vm5, %v999_v48, %v390_v12  ;;  %v1304_v48 = vmov 46  }
 0x213   :  { %v436_v26 = vpop.permute.xlu0 %435 }
 0x214   :  { %v442_v27 = vsub.f32 %v436_v26, %v441_v24 }
 0x216   :  { %v443_v29 = vand.u32 2147483647, %v442_v27 }
 0x218   :  { %v444_v31 = vadd.f32 %v443_v29, %v433_v28  ;;  %v463_v49 = vpop.permute.xlu0 %462 }
 0x219   :  { %v469_v55 = vsub.f32 %v463_v49, %v468_v50 }
 0x21a   :  { %v445_v33 = vsub.f32 0.0, %v444_v31 }
 0x21b   :  { %v470_v60 = vand.u32 2147483647, %v469_v55  ;;  %v1305_v55 = vmov 47  }
 0x21c   :  { %v446_v35 = vmul.f32 1.442695, %v445_v33 }
 0x21d   :  { %v474_v57 = vpop.permute.xlu0 %473 }
 0x21e   :  { %1213 = vpow2.f32 %v446_v35  ;;  %v480_v59 = vsub.f32 %v474_v57, %v479_v52  ;;  %v1307_v57 = vmov 49  }
 0x220   :  { %v481_v2 = vand.u32 2147483647, %v480_v59  ;;  %v1309_v59 = vmov 51  }
 0x228   :  { %v1214_v36 = vpop.eup %1213 }
 0x229   :  { %v448_v38 = vsel %vm87_vm0, %v1214_v36, 0.0 }
 0x22a   :  { %449 = vadd.xlane.f32.xlu1 %v448_v38 }
 0x23b   :  { %452 = vperm.xlu1 %1155, %v1358_v0  }
 0x23f   :  { %1158 = vset.pattern.permute.xlu1 %v1296_v39  ;;  %v561_v39 = vrot.slane %v1534_v21, %v1399_v41 }
 0x240   :  { %484 = vperm.xlu1 %1158, %v1358_v0  }
 0x244   :  { %1159 = vset.pattern.permute.xlu1 %v1297_v40 }
 0x245   :  { %495 = vperm.xlu1 %1159, %v1358_v0  }
 0x249   :  { %1160 = vset.pattern.permute.xlu1 %v1298_v42 }
 0x24a   :  { %512 = vperm.xlu1 %1160, %v1358_v0  }
 0x24e   :  { %1161 = vset.pattern.permute.xlu1 %v1299_v43 }
 0x24f   :  { %522 = vperm.xlu1 %1161, %v1358_v0  }
 0x253   :  { %1162 = vset.pattern.permute.xlu1 %v1300_v44 }
 0x254   :  { %533 = vperm.xlu1 %1162, %v1358_v0  }
 0x258   :  { %1163 = vset.pattern.permute.xlu1 %v1301_v45 }
 0x259   :  { %544 = vperm.xlu1 %1163, %v1358_v0  }
 0x25d   :  { %1164 = vset.pattern.permute.xlu1 %v1302_v46 }
 0x25e   :  { %555 = vperm.xlu1 %1164, %v1358_v0  }
 0x262   :  { %1166 = vset.pattern.permute.xlu1 %v1304_v48 }
 0x2b7   :  { %v450_v51 = vpop.xlane.xlu1 %449 }
 0x2b8   :  { %v1523_v53 = vsel %vm1002_vm6, %v1001_v20, %v450_v51 }
 0x2bb   :  { %v453_v58 = vpop.permute.xlu1 %452 }
 0x2bc   :  { %v459_v62 = vsub.f32 %v453_v58, %v458_v56  ;;  %v1306_v56 = vmov 48   ;;  %v1308_v58 = vmov 50  }
 0x2be   :  { %v460_v63 = vand.u32 2147483647, %v459_v62  ;;  %v1311_v62 = vmov 53  }
 0x2bf   :  { %v485_v4 = vpop.permute.xlu1 %484 }
 0x2c0   :  { %v471_v6 = vadd.f32 %v470_v60, %v460_v63  ;;  %v491_v7 = vsub.f32 %v485_v4, %v490_v17  ;;  %v1310_v60 = vmov 52   ;;  %v1312_v17 = vmov 54  }
 0x2c1   :  { %v1313_v63 = vmov 55  }
 0x2c2   :  { %v482_v10 = vadd.f32 %v481_v2, %v471_v6  ;;  %v492_v11 = vand.u32 2147483647, %v491_v7  ;;  %v1314_v2 = vmov 56  }
 0x2c4   :  { %v496_v13 = vpop.permute.xlu1 %495  ;;  %v493_v14 = vadd.f32 %v492_v11, %v482_v10  ;;  %v599_v11 = vrot.slane %v1534_v21, %v1411_v5 }
 0x2c5   :  { %v502_v54 = vsub.f32 %v496_v13, %v501_v8  ;;  %v578_v8 = vrot.slane %v1534_v21, %v1409_v3 }
 0x2c7   :  { %v503_v15 = vand.u32 2147483647, %v502_v54  ;;  %v588_v54 = vrot.slane %v1534_v21, %v1407_v1 }
 0x2c9   :  { %v504_v16 = vadd.f32 %v503_v15, %v493_v14  ;;  %v513_v18 = vpop.permute.xlu1 %512 }
 0x2ca   :  { %v519_v26 = vsub.f32 %v513_v18, %v518_v22 }
 0x2cb   :  { %v505_v19 = vsub.f32 0.0, %v504_v16 }
 0x2cc   :  { %v520_v35 = vand.u32 2147483647, %v519_v26 }
 0x2cd   :  { %v506_v12 = vmul.f32 1.442695, %v505_v19 }
 0x2ce   :  { %v523_v20 = vpop.permute.xlu1 %522 }
 0x2cf   :  { %1215 = vpow2.f32 %v506_v12  ;;  %v529_v25 = vsub.f32 %v523_v20, %v528_v9 }
 0x2d1   :  { %v530_v28 = vand.u32 2147483647, %v529_v25 }
 0x2d3   :  { %v534_v24 = vpop.permute.xlu1 %533  ;;  %v531_v40 = vadd.f32 %v530_v28, %v520_v35 }
 0x2d4   :  { %v540_v27 = vsub.f32 %v534_v24, %v539_v23 }
 0x2d6   :  { %v541_v36 = vand.u32 2147483647, %v540_v27 }
 0x2d8   :  { %v545_v29 = vpop.permute.xlu1 %544  ;;  %v542_v44 = vadd.f32 %v541_v36, %v531_v40 }
 0x2d9   :  { %v1216_v31 = vpop.eup %1215  ;;  %v551_v33 = vsub.f32 %v545_v29, %v550_v61 }
 0x2da   :  { %v508_v38 = vsel %vm87_vm0, %v1216_v31, 0.0 }
 0x2db   :  { %509 = vadd.xlane.f32.xlu0 %v508_v38  ;;  %v552_v42 = vand.u32 2147483647, %v551_v33 }
 0x2dd   :  { %v556_v43 = vpop.permute.xlu1 %555  ;;  %v553_v46 = vadd.f32 %v552_v42, %v542_v44 }
 0x2de   :  { %v562_v45 = vsub.f32 %v556_v43, %v561_v39 }
 0x2e0   :  { %v563_v47 = vand.u32 2147483647, %v562_v45 }
 0x2e2   :  { %v564_v48 = vadd.f32 %v563_v47, %v553_v46 }
 0x2e4   :  { %v565_v49 = vsub.f32 0.0, %v564_v48 }
 0x2e6   :  { %v566_v50 = vmul.f32 1.442695, %v565_v49 }
 0x2e8   :  { %1217 = vpow2.f32 %v566_v50 }
 0x2f1   :  { %572 = vperm.xlu0 %1165, %v1358_v0  }
 0x2f2   :  { %v1218_v51 = vpop.eup %1217 }
 0x2f3   :  { %v568_v52 = vsel %vm87_vm0, %v1218_v51, 0.0 }
 0x2f4   :  { %569 = vadd.xlane.f32.xlu1 %v568_v52 }
 0x2f5   :  { %1167 = vset.pattern.permute.xlu0 %v1305_v55 }
 0x2f6   :  { %593 = vperm.xlu0 %1167, %v1358_v0  }
 0x2fa   :  { %1175 = vset.pattern.permute.xlu0 %v1313_v63 }
 0x305   :  { %582 = vperm.xlu1 %1166, %v1358_v0  }
 0x309   :  { %1168 = vset.pattern.permute.xlu1 %v1306_v56 }
 0x30a   :  { %604 = vperm.xlu1 %1168, %v1358_v0  }
 0x30e   :  { %1169 = vset.pattern.permute.xlu1 %v1307_v57 }
 0x30f   :  { %615 = vperm.xlu1 %1169, %v1358_v0  }
 0x313   :  { %1170 = vset.pattern.permute.xlu1 %v1308_v58 }
 0x314   :  { %632 = vperm.xlu1 %1170, %v1358_v0  }
 0x318   :  { %1171 = vset.pattern.permute.xlu1 %v1309_v59 }
 0x319   :  { %642 = vperm.xlu1 %1171, %v1358_v0  }
 0x31d   :  { %1172 = vset.pattern.permute.xlu1 %v1310_v60 }
 0x31e   :  { %653 = vperm.xlu1 %1172, %v1358_v0  }
 0x322   :  { %1173 = vset.pattern.permute.xlu1 %v1311_v62 }
 0x323   :  { %664 = vperm.xlu1 %1173, %v1358_v0  }
 0x327   :  { %1174 = vset.pattern.permute.xlu1 %v1312_v17 }
 0x328   :  { %675 = vperm.xlu1 %1174, %v1358_v0  }
 0x32c   :  { %1176 = vset.pattern.permute.xlu1 %v1314_v2 }
 0x368   :  { %v510_v4 = vpop.xlane.xlu0 %509 }
 0x369   :  { %v1005_v6 = vsel %vm1004_vm7, %v1523_v53, %v510_v4  ;;  %v1571_v53 = vld [vmem:[%s1703_s1 + $0x30] sm:$0xff] }
 0x36a   :  { %v610_v12 = vrot.slane %v1571_v53, %v1385_v30  ;;  %v621_v21 = vrot.slane %v1571_v53, %v1393_v34  ;;  %v648_v39 = vrot.slane %v1571_v53, %v1395_v37  ;;  %v638_v40 = vrot.slane %v1571_v53, %v1390_v32 }
 0x36b   :  { %v659_v42 = vrot.slane %v1571_v53, %v1399_v41  ;;  %v670_v45 = vrot.slane %v1571_v53, %v1409_v3  ;;  %v681_v57 = vrot.slane %v1571_v53, %v1407_v1 }
 0x370   :  { %v573_v7 = vpop.permute.xlu0 %572 }
 0x371   :  { %v579_v0 = vsub.f32 %v573_v7, %v578_v8  ;;  %v1591_v8 = vld [vmem:[%s1702_s0] sm:$0xff] }
 0x373   :  { %v580_v18 = vand.u32 2147483647, %v579_v0  ;;  %v1315_v0 = vmov 58  }
 0x375   :  { %v594_v14 = vpop.permute.xlu0 %593 }
 0x376   :  { %v600_v16 = vsub.f32 %v594_v14, %v599_v11  ;;  %v1317_v14 = vmov 61  }
 0x378   :  { %v601_v9 = vand.u32 2147483647, %v600_v16  ;;  %v1319_v16 = vmov 57  }
 0x381   :  { %v570_v10 = vpop.xlane.xlu1 %569 }
 0x382   :  { %v1564_v13 = vsel %vm87_vm0, %v1005_v6, %v570_v10 }
 0x385   :  { %v583_v15 = vpop.permute.xlu1 %582 }
 0x386   :  { %v589_v19 = vsub.f32 %v583_v15, %v588_v54  ;;  %v1316_v54 = vmov 60   ;;  %v1318_v15 = vmov 62  }
 0x388   :  { %v590_v20 = vand.u32 2147483647, %v589_v19  ;;  %v1321_v19 = vmov 59  }
 0x389   :  { %v605_v22 = vpop.permute.xlu1 %604 }
 0x38a   :  { %v591_v23 = vadd.f32 %v590_v20, %v580_v18  ;;  %v611_v24 = vsub.f32 %v605_v22, %v610_v12  ;;  %v1320_v18 = vmov 63   ;;  %v1322_v12 = vmov 64  }
 0x38b   :  { %v1323_v20 = vmov 66   ;;  %v1325_v22 = vmov 70  }
 0x38c   :  { %v602_v25 = vadd.f32 %v601_v9, %v591_v23  ;;  %v612_v61 = vand.u32 2147483647, %v611_v24  ;;  %v1324_v9 = vmov 65   ;;  %v1326_v23 = vmov 67  }
 0x38d   :  { %v1327_v24 = vmov 72  }
 0x38e   :  { %v616_v26 = vpop.permute.xlu1 %615  ;;  %v613_v28 = vadd.f32 %v612_v61, %v602_v25  ;;  %v1329_v25 = vmov 74   ;;  %v1330_v61 = vmov 79  }
 0x38f   :  { %v622_v27 = vsub.f32 %v616_v26, %v621_v21  ;;  %v1328_v21 = vmov 73  }
 0x391   :  { %v623_v29 = vand.u32 2147483647, %v622_v27 }
 0x393   :  { %v624_v31 = vadd.f32 %v623_v29, %v613_v28  ;;  %v633_v33 = vpop.permute.xlu1 %632 }
 0x394   :  { %v639_v46 = vsub.f32 %v633_v33, %v638_v40  ;;  %v698_v40 = vrot.slane %v1571_v53, %v1411_v5 }
 0x395   :  { %v625_v35 = vsub.f32 0.0, %v624_v31 }
 0x396   :  { %v640_v52 = vand.u32 2147483647, %v639_v46 }
 0x397   :  { %v626_v36 = vmul.f32 1.442695, %v625_v35  ;;  %v26_v35 = vld [vmem:[%s1703_s1 + $0x38] sm:$0xff] }
 0x398   :  { %v643_v38 = vpop.permute.xlu1 %642 }
 0x399   :  { %1219 = vpow2.f32 %v626_v36  ;;  %v649_v44 = vsub.f32 %v643_v38, %v648_v39  ;;  %v758_v36 = vrot.slane %v26_v35, %v1399_v41  ;;  %v768_v38 = vrot.slane %v26_v35, %v1409_v3 }
 0x39b   :  { %v650_v48 = vand.u32 2147483647, %v649_v44 }
 0x39d   :  { %v654_v43 = vpop.permute.xlu1 %653  ;;  %v651_v58 = vadd.f32 %v650_v48, %v640_v52  ;;  %v790_v52 = vrot.slane %v26_v35, %v1411_v5 }
 0x39e   :  { %v660_v47 = vsub.f32 %v654_v43, %v659_v42  ;;  %v779_v43 = vrot.slane %v26_v35, %v1407_v1 }
 0x3a0   :  { %v661_v55 = vand.u32 2147483647, %v660_v47 }
 0x3a2   :  { %v665_v49 = vpop.permute.xlu1 %664  ;;  %v662_v62 = vadd.f32 %v661_v55, %v651_v58 }
 0x3a3   :  { %v1220_v50 = vpop.eup %1219  ;;  %v671_v51 = vsub.f32 %v665_v49, %v670_v45  ;;  %v730_v45 = vrot.slane %v26_v35, %v1390_v32 }
 0x3a4   :  { %v628_v56 = vsel %vm87_vm0, %v1220_v50, 0.0 }
 0x3a5   :  { %629 = vadd.xlane.f32.xlu0 %v628_v56  ;;  %v672_v59 = vand.u32 2147483647, %v671_v51  ;;  %v719_v51 = vrot.slane %v26_v35, %v1393_v34  ;;  %v1629_v56 = vld [vmem:[%s1703_s1 + $0x40] sm:$0xff] }
 0x3a7   :  { %v676_v60 = vpop.permute.xlu1 %675  ;;  %v673_v63 = vadd.f32 %v672_v59, %v662_v62 }
 0x3a8   :  { %v682_v17 = vsub.f32 %v676_v60, %v681_v57 }
 0x3aa   :  { %v683_v2 = vand.u32 2147483647, %v682_v17 }
 0x3ac   :  { %v684_v4 = vadd.f32 %v683_v2, %v673_v63 }
 0x3ae   :  { %v685_v6 = vsub.f32 0.0, %v684_v4 }
 0x3b0   :  { %v686_v7 = vmul.f32 1.442695, %v685_v6  ;;  %v741_v6 = vrot.slane %v26_v35, %v1395_v37 }
 0x3b2   :  { %1221 = vpow2.f32 %v686_v7  ;;  %v801_v7 = vrot.slane %v1629_v56, %v1385_v30 }
 0x3bb   :  { %692 = vperm.xlu0 %1175, %v1591_v8  }
 0x3bc   :  { %v1222_v10 = vpop.eup %1221 }
 0x3bd   :  { %v688_v11 = vsel %vm87_vm0, %v1222_v10, 0.0 }
 0x3be   :  { %689 = vadd.xlane.f32.xlu1 %v688_v11 }
 0x3bf   :  { %1178 = vset.pattern.permute.xlu0 %v1315_v0 }
 0x3c0   :  { %724 = vperm.xlu0 %1178, %v1591_v8  }
 0x3c4   :  { %1180 = vset.pattern.permute.xlu0 %v1316_v54 }
 0x3c5   :  { %752 = vperm.xlu0 %1180, %v1591_v8  }
 0x3c9   :  { %1181 = vset.pattern.permute.xlu0 %v1317_v14 }
 0x3ca   :  { %762 = vperm.xlu0 %1181, %v1591_v8  }
 0x3ce   :  { %1182 = vset.pattern.permute.xlu0 %v1318_v15 }
 0x3cf   :  { %702 = vperm.xlu1 %1176, %v1591_v8   ;;  %773 = vperm.xlu0 %1182, %v1591_v8  }
 0x3d3   :  { %1177 = vset.pattern.permute.xlu1 %v1319_v16  ;;  %1183 = vset.pattern.permute.xlu0 %v1320_v18 }
 0x3d4   :  { %713 = vperm.xlu1 %1177, %v1591_v8   ;;  %784 = vperm.xlu0 %1183, %v1591_v8  }
 0x3d8   :  { %1179 = vset.pattern.permute.xlu1 %v1321_v19  ;;  %1184 = vset.pattern.permute.xlu0 %v1322_v12 }
 0x3d9   :  { %735 = vperm.xlu1 %1179, %v1591_v8   ;;  %795 = vperm.xlu0 %1184, %v1591_v8  }
 0x3dd   :  { %1186 = vset.pattern.permute.xlu0 %v1323_v20  ;;  %1185 = vset.pattern.permute.xlu1 %v1324_v9 }
 0x3de   :  { %822 = vperm.xlu0 %1186, %v1591_v8  }
 0x3e2   :  { %1187 = vset.pattern.permute.xlu0 %v1325_v22 }
 0x3e3   :  { %872 = vperm.xlu0 %1187, %v1591_v8  }
 0x3e7   :  { %1189 = vset.pattern.permute.xlu0 %v1326_v23 }
 0x3e8   :  { %833 = vperm.xlu0 %1189, %v1591_v8  }
 0x3ec   :  { %1192 = vset.pattern.permute.xlu0 %v1327_v24 }
 0x3ed   :  { %893 = vperm.xlu0 %1192, %v1591_v8  }
 0x3f1   :  { %1195 = vset.pattern.permute.xlu0 %v1328_v21 }
 0x3f2   :  { %904 = vperm.xlu0 %1195, %v1591_v8  }
 0x3f6   :  { %1198 = vset.pattern.permute.xlu0 %v1329_v25 }
 0x3f7   :  { %915 = vperm.xlu0 %1198, %v1591_v8  }
 0x3fb   :  { %1200 = vset.pattern.permute.xlu0 %v1330_v61 }
 0x432   :  { %v630_v26 = vpop.xlane.xlu0 %629 }
 0x433   :  { %v1008_v27 = vsel %vm1007_vm8, %v1564_v13, %v630_v26  ;;  %v708_v13 = vrot.slane %v26_v35, %v1385_v30 }
 0x43a   :  { %v693_v28 = vpop.permute.xlu0 %692 }
 0x43b   :  { %v699_v49 = vsub.f32 %v693_v28, %v698_v40  ;;  %v1333_v40 = vmov 76  }
 0x43d   :  { %v700_v62 = vand.u32 2147483647, %v699_v49 }
 0x43f   :  { %v725_v29 = vpop.permute.xlu0 %724 }
 0x440   :  { %v731_v17 = vsub.f32 %v725_v29, %v730_v45  ;;  %v1337_v45 = vmov 78  }
 0x442   :  { %v732_v14 = vand.u32 2147483647, %v731_v17 }
 0x444   :  { %v753_v31 = vpop.permute.xlu0 %752 }
 0x445   :  { %v759_v46 = vsub.f32 %v753_v31, %v758_v36 }
 0x447   :  { %v760_v57 = vand.u32 2147483647, %v759_v46 }
 0x449   :  { %v763_v33 = vpop.permute.xlu0 %762 }
 0x44a   :  { %v769_v47 = vsub.f32 %v763_v33, %v768_v38  ;;  %v1331_v38 = vmov 71  }
 0x44b   :  { %v690_v39 = vpop.xlane.xlu1 %689 }
 0x44c   :  { %v1619_v42 = vsel %vm1009_vm9, %v1008_v27, %v690_v39  ;;  %v770_v58 = vand.u32 2147483647, %v769_v47  ;;  %v1332_v39 = vmov 75  }
 0x44e   :  { %v774_v44 = vpop.permute.xlu0 %773  ;;  %v771_v0 = vadd.f32 %v770_v58, %v760_v57 }
 0x44f   :  { %v703_v48 = vpop.permute.xlu1 %702  ;;  %v780_v55 = vsub.f32 %v774_v44, %v779_v43  ;;  %v1335_v43 = vmov 77   ;;  %v1336_v44 = vmov 69  }
 0x450   :  { %v709_v50 = vsub.f32 %v703_v48, %v708_v13  ;;  %v1334_v13 = vmov 68  }
 0x451   :  { %v781_v4 = vand.u32 2147483647, %v780_v55  ;;  %v1650_v55 = vld [vmem:[%s1703_s1 + $0x48] sm:$0xff]  ;;  %s1339_s1 = smov [#allocation2]  }
 0x452   :  { %v710_v53 = vand.u32 2147483647, %v709_v50  ;;  %v899_v57 = vrot.slane %v1650_v55, %v1385_v30  ;;  %v921_v17 = vrot.slane %v1650_v55, %v1390_v32  ;;  %s1030_s4 = sshll.u32 %s1339_s1, 4  ;;  %s1031_s4 = int_to_ptr.vmem [resolvable:$true] %s1030_s4 }
 0x453   :  { %v714_v59 = vpop.permute.xlu1 %713  ;;  %v785_v60 = vpop.permute.xlu0 %784  ;;  %v782_v19 = vadd.f32 %v781_v4, %v771_v0  ;;  %s1234_s5 = scalar_lea.vmem %s1031_s4, 128  ;;  %p1239_p1 = scmp.lt.s32.totalorder %s1031_s4, %s1031_s4 }
 0x454   :  { %v720_v63 = vsub.f32 %v714_v59, %v719_v51  ;;  %v791_v2 = vsub.f32 %v785_v60, %v790_v52  ;;  %v711_v10 = vadd.f32 %v710_v53, %v700_v62  ;;  %v910_v60 = vrot.slane %v1650_v55, %v1393_v34  ;;  %p1235_p0 = scmp.ne.s32.totalorder %s1031_s4, %s1234_s5  ;;  %p1240_p2 = scmp.lt.s32.totalorder %s1234_s5, %s1234_s5 }
 0x456   :  { %v721_v11 = vand.u32 2147483647, %v720_v63  ;;  %v792_v54 = vand.u32 2147483647, %v791_v2  ;;  %p1241_p3 = por %p1240_p2, %p1239_p1 }
 0x458   :  { %v722_v15 = vadd.f32 %v721_v11, %v711_v10  ;;  %v736_v16 = vpop.permute.xlu1 %735  ;;  %v796_v18 = vpop.permute.xlu0 %795  ;;  %v793_v22 = vadd.f32 %v792_v54, %v782_v19  ;;  %v828_v19 = vrot.slane %v1629_v56, %v1390_v32  ;;  %p1242_p4 = pnand %p1241_p3, %p1235_p0 }
 0x459   :  { %v742_v12 = vsub.f32 %v736_v16, %v741_v6  ;;  %v802_v20 = vsub.f32 %v796_v18, %v801_v7 }
 0x45a   :  { %v733_v9 = vadd.f32 %v732_v14, %v722_v15 }
 0x45b   :  { %v743_v23 = vand.u32 2147483647, %v742_v12  ;;  %v803_v24 = vand.u32 2147483647, %v802_v20  ;;  %v818_v12 = vrot.slane %v1629_v56, %v1393_v34 }
 0x45d   :  { %v744_v21 = vadd.f32 %v743_v23, %v733_v9  ;;  %v804_v25 = vadd.f32 %v803_v24, %v793_v22  ;;  %v823_v46 = vpop.permute.xlu0 %822  ;;  %v839_v24 = vrot.slane %v1629_v56, %v1395_v37 }
 0x45e   :  { %v829_v23 = vsub.f32 %v823_v46, %v828_v19 }
 0x45f   :  { %v745_v26 = vsub.f32 0.0, %v744_v21  ;;  %v805_v27 = vsub.f32 0.0, %v804_v25 }
 0x461   :  { %v746_v28 = vmul.f32 1.442695, %v745_v26  ;;  %v806_v29 = vmul.f32 1.442695, %v805_v27  ;;  %v850_v27 = vrot.slane %v1629_v56, %v1399_v41 }
 0x462   :  { %v873_v47 = vpop.permute.xlu0 %872 }
 0x463   :  { %1223 = vpow2.f32 %v746_v28  ;;  %v830_v28 = vand.u32 2147483647, %v829_v23 }
 0x464   :  { %1225 = vpow2.f32 %v806_v29 }
 0x467   :  { %v834_v48 = vpop.permute.xlu0 %833 }
 0x468   :  { %v840_v29 = vsub.f32 %v834_v48, %v839_v24 }
 0x46a   :  { %v841_v34 = vand.u32 2147483647, %v840_v29 }
 0x46c   :  { %v894_v50 = vpop.permute.xlu0 %893 }
 0x46d   :  { %v1224_v31 = vpop.eup %1223  ;;  %v900_v62 = vsub.f32 %v894_v50, %v899_v57 }
 0x46e   :  { %v748_v33 = vsel %vm87_vm0, %v1224_v31, 0.0  ;;  %v1226_v35 = vpop.eup %1225 }
 0x46f   :  { %749 = vadd.xlane.f32.xlu1 %v748_v33  ;;  %v808_v36 = vsel %vm87_vm0, %v1226_v35, 0.0  ;;  %v901_v10 = vand.u32 2147483647, %v900_v62 }
 0x473   :  { %809 = vadd.xlane.f32.xlu1 %v808_v36  ;;  %v948_v36 = vrot.slane %v1650_v55, %v1399_v41 }
 0x484   :  { %812 = vperm.xlu1 %1185, %v1591_v8  }
 0x488   :  { %1188 = vset.pattern.permute.xlu1 %v1331_v38  ;;  %v861_v38 = vrot.slane %v1629_v56, %v1409_v3 }
 0x489   :  { %882 = vperm.xlu1 %1188, %v1591_v8  }
 0x48d   :  { %1190 = vset.pattern.permute.xlu1 %v1332_v39  ;;  %v938_v39 = vrot.slane %v1650_v55, %v1395_v37 }
 0x48e   :  { %932 = vperm.xlu1 %1190, %v1591_v8  }
 0x492   :  { %1191 = vset.pattern.permute.xlu1 %v1333_v40 }
 0x493   :  { %942 = vperm.xlu1 %1191, %v1591_v8  }
 0x497   :  { %1193 = vset.pattern.permute.xlu1 %v1334_v13  ;;  %v959_v13 = vrot.slane %v1650_v55, %v1409_v3 }
 0x498   :  { %844 = vperm.xlu1 %1193, %v1591_v8  }
 0x49c   :  { %1194 = vset.pattern.permute.xlu1 %v1335_v43 }
 0x49d   :  { %953 = vperm.xlu1 %1194, %v1591_v8  }
 0x4a1   :  { %1196 = vset.pattern.permute.xlu1 %v1336_v44 }
 0x4a2   :  { %855 = vperm.xlu1 %1196, %v1591_v8  }
 0x4a6   :  { %1197 = vset.pattern.permute.xlu1 %v1337_v45 }
 0x4a7   :  { %964 = vperm.xlu1 %1197, %v1591_v8  }
 0x4ab   :  { %1199 = vset.pattern.permute.xlu1 %v1330_v61  ;;  %v878_v61 = vrot.slane %v1629_v56, %v1407_v1 }
 0x4ac   :  { %975 = vperm.xlu1 %1199, %v1591_v8   ;;  %v905_v8 = vpop.permute.xlu0 %904 }
 0x4ad   :  { %v879_v59 = vsub.f32 %v873_v47, %v878_v61  ;;  %v911_v7 = vsub.f32 %v905_v8, %v910_v60 }
 0x4af   :  { %v880_v4 = vand.u32 2147483647, %v879_v59  ;;  %v912_v54 = vand.u32 2147483647, %v911_v7  ;;  %v981_v59 = vrot.slane %v1650_v55, %v1411_v5 }
 0x4b0   :  { %v916_v2 = vpop.permute.xlu0 %915 }
 0x4b1   :  { %v922_v30 = vsub.f32 %v916_v2, %v921_v17 }
 0x4b3   :  { %v923_v16 = vand.u32 2147483647, %v922_v30 }
 0x4fc   :  { %v750_v49 = vpop.xlane.xlu1 %749 }
 0x4fd   :  { %v1012_v51 = vsel %vm1011_vm10, %v1619_v42, %v750_v49  ;;  %v888_v42 = vrot.slane %v1629_v56, %v1411_v5  ;;  %v970_v49 = vrot.slane %v1650_v55, %v1407_v1  ;;  %v1338_v55 = vmov 0.0  }
 0x4fe   :  { %17 = vst.msk [vmem:[#allocation2] sm:$0xff] %vm16_vm12, %v1338_v55 }
 0x500   :  { %v810_v52 = vpop.xlane.xlu1 %809 }
 0x501   :  { %v1654_v53 = vsel %vm1013_vm11, %v1012_v51, %v810_v52 }
 0x504   :  { %v813_v58 = vpop.permute.xlu1 %812 }
 0x505   :  { %v819_v21 = vsub.f32 %v813_v58, %v818_v12 }
 0x507   :  { %v820_v32 = vand.u32 2147483647, %v819_v21 }
 0x508   :  { %v883_v63 = vpop.permute.xlu1 %882 }
 0x509   :  { %v889_v6 = vsub.f32 %v883_v63, %v888_v42  ;;  %v831_v35 = vadd.f32 %v830_v28, %v820_v32 }
 0x50b   :  { %v890_v11 = vand.u32 2147483647, %v889_v6  ;;  %v842_v45 = vadd.f32 %v841_v34, %v831_v35 }
 0x50d   :  { %v891_v0 = vadd.f32 %v890_v11, %v880_v4  ;;  %v933_v14 = vpop.permute.xlu1 %932 }
 0x50e   :  { %v939_v48 = vsub.f32 %v933_v14, %v938_v39 }
 0x50f   :  { %v902_v15 = vadd.f32 %v901_v10, %v891_v0 }
 0x510   :  { %v940_v3 = vand.u32 2147483647, %v939_v48 }
 0x511   :  { %v913_v18 = vadd.f32 %v912_v54, %v902_v15 }
 0x512   :  { %v943_v20 = vpop.permute.xlu1 %942 }
 0x513   :  { %v924_v9 = vadd.f32 %v923_v16, %v913_v18  ;;  %v949_v44 = vsub.f32 %v943_v20, %v948_v36  ;;  %v991_v16 = vld [vmem:[#allocation2] sm:$0xff] }
 0x515   :  { %v925_v22 = vsub.f32 0.0, %v924_v9  ;;  %v950_v37 = vand.u32 2147483647, %v949_v44 }
 0x517   :  { %v926_v25 = vmul.f32 1.442695, %v925_v22  ;;  %v845_v26 = vpop.permute.xlu1 %844  ;;  %v951_v42 = vadd.f32 %v950_v37, %v940_v3 }
 0x518   :  { %v851_v31 = vsub.f32 %v845_v26, %v850_v27 }
 0x519   :  { %1227 = vpow2.f32 %v926_v25 }
 0x51a   :  { %v852_v40 = vand.u32 2147483647, %v851_v31 }
 0x51c   :  { %v954_v33 = vpop.permute.xlu1 %953  ;;  %v853_v41 = vadd.f32 %v852_v40, %v842_v45 }
 0x51d   :  { %v960_v50 = vsub.f32 %v954_v33, %v959_v13 }
 0x51f   :  { %v961_v57 = vand.u32 2147483647, %v960_v50 }
 0x521   :  { %v856_v43 = vpop.permute.xlu1 %855  ;;  %v962_v17 = vadd.f32 %v961_v57, %v951_v42 }
 0x522   :  { %v862_v46 = vsub.f32 %v856_v43, %v861_v38 }
 0x523   :  { %v1228_v47 = vpop.eup %1227 }
 0x524   :  { %v863_v51 = vand.u32 2147483647, %v862_v46  ;;  %v928_v56 = vsel %vm87_vm0, %v1228_v47, 0.0 }
 0x525   :  { %929 = vadd.xlane.f32.xlu0 %v928_v56 }
 0x526   :  { %v864_v52 = vadd.f32 %v863_v51, %v853_v41  ;;  %v965_v61 = vpop.permute.xlu1 %964 }
 0x527   :  { %v971_v8 = vsub.f32 %v965_v61, %v970_v49 }
 0x528   :  { %v865_v58 = vsub.f32 0.0, %v864_v52 }
 0x529   :  { %v972_v62 = vand.u32 2147483647, %v971_v8 }
 0x52a   :  { %v866_v60 = vmul.f32 1.442695, %v865_v58 }
 0x52b   :  { %v976_v1 = vpop.permute.xlu1 %975  ;;  %v973_v2 = vadd.f32 %v972_v62, %v962_v17 }
 0x52c   :  { %1229 = vpow2.f32 %v866_v60  ;;  %v982_v63 = vsub.f32 %v976_v1, %v981_v59 }
 0x52e   :  { %v983_v4 = vand.u32 2147483647, %v982_v63 }
 0x530   :  { %v984_v6 = vadd.f32 %v983_v4, %v973_v2 }
 0x532   :  { %v985_v7 = vsub.f32 0.0, %v984_v6 }
 0x534   :  { %v986_v10 = vmul.f32 1.442695, %v985_v7 }
 0x536   :  { %v1230_v11 = vpop.eup %1229  ;;  %1231 = vpow2.f32 %v986_v10 }
 0x537   :  { %v868_v30 = vsel %vm87_vm0, %v1230_v11, 0.0 }
 0x538   :  { %869 = vadd.xlane.f32.xlu1 %v868_v30 }
 0x540   :  { %v1232_v0 = vpop.eup %1231 }
 0x541   :  { %v988_v5 = vsel %vm87_vm0, %v1232_v0, 0.0 }
 0x542   :  { %989 = vadd.xlane.f32.xlu0 %v988_v5 }
 0x5b2   :  { %v930_v14 = vpop.xlane.xlu0 %929 }
 0x5c5   :  { %v870_v54 = vpop.xlane.xlu1 %869 }
 0x5c6   :  { %v1016_v15 = vsel %vm1015_vm13, %v1654_v53, %v870_v54 }
 0x5c7   :  { %v1018_v18 = vsel %vm1017_vm14, %v1016_v15, %v930_v14 }
 0x5cf   :  { %v990_v19 = vpop.xlane.xlu0 %989 }
 0x5d0   :  { %v1020_v12 = vsel %vm1019_vm15, %v1018_v18, %v990_v19 }
 0x5d1   :  { %v1021_v20 = vadd.f32 %v1020_v12, %v991_v16 }
 0x5d3   :  { %1023 = vst.msk [vmem:[#allocation2] sm:$0xff] %vm16_vm12, %v1021_v20 }
 0x5d4   :  { %1245 = shalt.err (!%p1242_p4)
}
 0x5d5   :  { %s1246_s8 = scalar_lea.hbm %s1704_s2, 128 }
 0x5d6   :  { %p1247_p5 = scmp.ne.s32.totalorder %s1704_s2, %s1246_s8  ;;  %p1250_p6 = scmp.lt.u32.totalorder %s1246_s8, %s1704_s2 }
 0x5d8   :  { %p1252_p7 = pnand %p1250_p6, %p1247_p5 }
 0x5da   :  { %1255 = shalt.err (!%p1252_p7)
}
 0x5db   :  { %1033 = dma.vmem_to_hbm [thread:$0]  %s1031_s4, 128, %s1704_s2, [#allocation3]  }
 0x5dc   :  { %1256 = dma.done.wait [#allocation3], 128  }
 0x5dd   :  { %1257 = vsyncadd [#allocation3], 4294967168 }
 0x5de   :  { %1037 = vsyncpa [#allocation3], 1 }

</bundles_post_ra>
